<compile_context>
chip_gen: v6e
topology: v6e:2x2x1
jax: 0.10.0
libtpu: 0.0.40
codegen_flags: <defaults>
</compile_context>

<pallas_src>
import functools

import jax
import jax.numpy as jnp
from jax.experimental import pallas as pl
from jax.experimental.pallas import tpu as pltpu


def _gcn3_kernel(x_ref, a_ref, w1_ref, b1_ref, w2_ref, b2_ref, w3_ref, b3_ref,
                 o_ref, g0_ref, h1_ref, h2_ref, acc_ref, *, tm, tk, n_out):
    """Fused 3-layer GCN.  Grid = (layer, row_tile_i, src_tile_k)."""
    f32 = jnp.float32
    layer = pl.program_id(0)
    i = pl.program_id(1)
    k = pl.program_id(2)
    nk = pl.num_programs(2)

    # ---- one-time prologue: G0 = X @ W1 (layer 1 reassociated to A @ (X@W1)) ----
    @pl.when((layer == 0) & (i == 0) & (k == 0))
    def _():
        g0 = jnp.dot(x_ref[...], w1_ref[...], preferred_element_type=f32)
        g0_ref[...] = g0.astype(g0_ref.dtype)

    # ---- zero the per-row-tile accumulator at the start of each contraction ----
    @pl.when(k == 0)
    def _():
        acc_ref[...] = jnp.zeros_like(acc_ref)

    a = a_ref[...]                                        # (tm, tk) bf16 A_hat tile
    ks = pl.ds(pl.multiple_of(k * tk, tk), tk)            # src slice of the H buffer

    # acc += A[i, k] @ H_prev[k]   (source buffer depends on the layer)
    @pl.when(layer == 0)
    def _():
        acc_ref[...] += jnp.dot(a, g0_ref[ks, :], preferred_element_type=f32)

    @pl.when(layer == 1)
    def _():
        acc_ref[...] += jnp.dot(a, h1_ref[ks, :], preferred_element_type=f32)

    @pl.when(layer == 2)
    def _():
        acc_ref[...] += jnp.dot(a, h2_ref[ks, :], preferred_element_type=f32)

    # ---- per-layer epilogue on the finished row tile ----
    @pl.when(k == nk - 1)
    def _():
        rs = pl.ds(pl.multiple_of(i * tm, tm), tm)
        acc = acc_ref[...]                                # (tm, hidden) f32

        @pl.when(layer == 0)
        def _():
            # H1 = relu(A @ (X @ W1) + b1)
            h1 = jnp.maximum(acc + b1_ref[...], 0.0)
            h1_ref[rs, :] = h1.astype(h1_ref.dtype)

        @pl.when(layer == 1)
        def _():
            # H2 = (A @ H1) @ W2 + b2
            h2 = jnp.dot(acc.astype(w2_ref.dtype), w2_ref[...],
                         preferred_element_type=f32) + b2_ref[...]
            h2_ref[rs, :] = h2.astype(h2_ref.dtype)

        @pl.when(layer == 2)
        def _():
            # Y = (A @ H2) @ W3_pad + b3_pad, masked log_softmax over real lanes
            y = jnp.dot(acc.astype(w3_ref.dtype), w3_ref[...],
                        preferred_element_type=f32) + b3_ref[...]
            lane = jax.lax.broadcasted_iota(jnp.int32, y.shape, 1)
            valid = lane < n_out
            ym = jnp.where(valid, y, -jnp.inf)
            m = jnp.max(ym, axis=-1, keepdims=True)
            z = ym - m
            lse = jnp.log(jnp.sum(jnp.exp(z), axis=-1, keepdims=True))
            o_ref[...] = jnp.where(valid, z - lse, 0.0).astype(o_ref.dtype)


def gcn_forward(x, a_hat, params, *, tm=None, tk=None, mxu_dtype=jnp.bfloat16):
    """Fused 3-layer GCN forward: log_softmax(L3(L2(relu(L1(x)))))."""
    (w1, b1), (w2, b2), (w3, b3) = params
    n, _ = x.shape
    hidden = w1.shape[1]
    fout = w3.shape[1]
    f32 = jnp.float32

    # Lane-dense padded output width (review item 3).
    pad_out = max(128, ((fout + 127) // 128) * 128)
    w3p = jnp.zeros((hidden, pad_out), f32).at[:, :fout].set(w3.astype(f32))
    b3p = jnp.zeros((1, pad_out), f32).at[:, :fout].set(b3.reshape(1, -1).astype(f32))

    # Tile-size selection: biggest 128-multiple dividing N, else the full dim.
    def _pick(t):
        if t is not None:
            return t
        for cand in (512, 256, 128):
            if n % cand == 0:
                return cand
        return n
    tm, tk = _pick(tm), _pick(tk)
    assert n % tm == 0 and n % tk == 0, (n, tm, tk)

    args = (
        x.astype(mxu_dtype),
        a_hat.astype(mxu_dtype),
        w1.astype(mxu_dtype), b1.reshape(1, hidden).astype(f32),
        w2.astype(mxu_dtype), b2.reshape(1, hidden).astype(f32),
        w3p.astype(mxu_dtype), b3p,
    )

    def full_spec(arr):
        return pl.BlockSpec(arr.shape, lambda l, i, k: (0,) * arr.ndim)

    in_specs = [
        full_spec(args[0]),                               # x        (whole, VMEM, once)
        pl.BlockSpec((tm, tk), lambda l, i, k: (i, k)),   # A_hat tile (pipelined)
        full_spec(args[2]), full_spec(args[3]),           # W1, b1
        full_spec(args[4]), full_spec(args[5]),           # W2, b2
        full_spec(args[6]), full_spec(args[7]),           # W3_pad, b3_pad
    ]
    out_specs = pl.BlockSpec((tm, pad_out), lambda l, i, k: (i, 0))

    kernel = functools.partial(_gcn3_kernel, tm=tm, tk=tk, n_out=fout)

    out_padded = pl.pallas_call(
        kernel,
        out_shape=jax.ShapeDtypeStruct((n, pad_out), f32),
        grid=(3, n // tm, n // tk),
        in_specs=in_specs,
        out_specs=out_specs,
        scratch_shapes=[
            pltpu.VMEM((n, hidden), mxu_dtype),    # G0 = X @ W1
            pltpu.VMEM((n, hidden), mxu_dtype),    # H1
            pltpu.VMEM((n, hidden), mxu_dtype),    # H2
            pltpu.VMEM((tm, hidden), jnp.float32), # A @ H accumulator
        ],
        compiler_params=pltpu.CompilerParams(
            # Layer axis carries the H1/H2 dependency through VMEM scratch and the
            # row axis reads all of the previous layer's rows -> both sequential.
            dimension_semantics=("arbitrary", "arbitrary", "arbitrary")),
    )(*args)

    return out_padded[:, :fout]


def build_normalized_adjacency(adj_dst_src):
    """Replicates Propagate.gcn_norm + forward normalization.

    adj_dst_src[v, u] = 1.0 iff there is an edge u -> v (rows = dst, cols = src).
    Degrees are computed on the graph WITH self loops (gcn_norm adds them to a
    local copy); aggregation uses the original adjacency, matching the code:
        Ahat[v, u] = out_deg(v)^-0.5 * A[v, u] * in_deg(u)^-0.5
    """
    n = adj_dst_src.shape[0]
    a_sl = adj_dst_src + jnp.eye(n, dtype=adj_dst_src.dtype)
    in_deg = jnp.maximum(jnp.sum(a_sl, axis=1), 1.0)     # in_degrees(node)
    out_deg = jnp.maximum(jnp.sum(a_sl, axis=0), 1.0)    # out_degrees(node)
    norm_in = in_deg ** -0.5                             # applied to source column u
    norm_out = out_deg ** -0.5                           # applied to destination row v
    return norm_out[:, None] * adj_dst_src * norm_in[None, :]


def gcn_forward_reference(x, a_hat, params):
    """Pure-JAX f32 reference of the same forward pass (for verification)."""
    (w1, b1), (w2, b2), (w3, b3) = params
    h = jnp.maximum((a_hat @ x) @ w1 + b1, 0.0)
    h = (a_hat @ h) @ w2 + b2
    y = (a_hat @ h) @ w3 + b3
    return jax.nn.log_softmax(y, axis=-1)


def init_linear(key, fin, fout):
    kw, kb = jax.random.split(key)
    bound = 1.0 / jnp.sqrt(jnp.float32(fin))
    w = jax.random.uniform(kw, (fin, fout), jnp.float32, -bound, bound)
    b = jax.random.uniform(kb, (fout,), jnp.float32, -bound, bound)
    return w, b


if __name__ == "__main__":
    key = jax.random.PRNGKey(0)
    k_graph, k_x, k1, k2, k3 = jax.random.split(key, 5)

    N = 256             # number of nodes (multiple of the 128 tile -> grid (3, 2, 2))
    IN_FEATURES = 16
    HIDDEN = 128        # torch module default hidden_features (lane-dense)
    OUT_FEATURES = 8

    # Deterministic random directed graph (dense adjacency, dst x src, no self loops).
    adj = (jax.random.uniform(k_graph, (N, N)) < 0.05).astype(jnp.float32)
    adj = adj * (1.0 - jnp.eye(N, dtype=jnp.float32))
    a_hat = build_normalized_adjacency(adj)

    x = jax.random.normal(k_x, (N, IN_FEATURES), jnp.float32)

    params = (
        init_linear(k1, IN_FEATURES, HIDDEN),
        init_linear(k2, HIDDEN, HIDDEN),
        init_linear(k3, HIDDEN, OUT_FEATURES),
    )

    out = gcn_forward(x, a_hat, params, tm=128, tk=128)
    out = jax.block_until_ready(out)

    assert out.shape == (N, OUT_FEATURES)
    assert bool(jnp.all(jnp.isfinite(out)))
    # log_softmax rows should exponentiate-and-sum to ~1
    assert bool(jnp.all(jnp.abs(jnp.sum(jnp.exp(out), axis=1) - 1.0) < 1e-3))
    # Check against pure-JAX f32 reference (loose tol: bf16 MXU inputs).
    ref = gcn_forward_reference(x, a_hat, params)
    err = float(jnp.max(jnp.abs(out - ref)))
    assert err < 0.2, f"max abs err vs f32 reference: {err}"
    print("KERNEL_OK")
</pallas_src>

<mosaic_0001>
module attributes {stable_mosaic.version = 11 : i64} {
  func.func @_gcn3_kernel(%arg0: i32, %arg1: i32, %arg2: i32, %arg3: memref<256x16xbf16, #tpu.memory_space<vmem>>, %arg4: memref<128x128xbf16, #tpu.memory_space<vmem>>, %arg5: memref<16x128xbf16, #tpu.memory_space<vmem>>, %arg6: memref<1x128xf32, #tpu.memory_space<vmem>>, %arg7: memref<128x128xbf16, #tpu.memory_space<vmem>>, %arg8: memref<1x128xf32, #tpu.memory_space<vmem>>, %arg9: memref<128x128xbf16, #tpu.memory_space<vmem>>, %arg10: memref<1x128xf32, #tpu.memory_space<vmem>>, %arg11: memref<128x128xf32, #tpu.memory_space<vmem>>, %arg12: memref<256x128xbf16, #tpu.memory_space<vmem>>, %arg13: memref<256x128xbf16, #tpu.memory_space<vmem>>, %arg14: memref<256x128xbf16, #tpu.memory_space<vmem>>, %arg15: memref<128x128xf32, #tpu.memory_space<vmem>>) attributes {dimension_semantics = [#tpu.dimension_semantics<arbitrary>, #tpu.dimension_semantics<arbitrary>, #tpu.dimension_semantics<arbitrary>], iteration_bounds = array<i64: 3, 2, 2>, scalar_prefetch = 0 : i64, scratch_operands = 4 : i64, tpu.core_type = #tpu.core_type<tc>, window_params = [{pipeline_mode = #tpu.pipeline_mode<synchronous>, transform_indices = @transform_0, window_bounds = array<i64: 256, 16>}, {transform_indices = @transform_1, window_bounds = array<i64: 128, 128>}, {pipeline_mode = #tpu.pipeline_mode<synchronous>, transform_indices = @transform_2, window_bounds = array<i64: 16, 128>}, {pipeline_mode = #tpu.pipeline_mode<synchronous>, transform_indices = @transform_3, window_bounds = array<i64: 1, 128>}, {pipeline_mode = #tpu.pipeline_mode<synchronous>, transform_indices = @transform_4, window_bounds = array<i64: 128, 128>}, {pipeline_mode = #tpu.pipeline_mode<synchronous>, transform_indices = @transform_5, window_bounds = array<i64: 1, 128>}, {pipeline_mode = #tpu.pipeline_mode<synchronous>, transform_indices = @transform_6, window_bounds = array<i64: 128, 128>}, {pipeline_mode = #tpu.pipeline_mode<synchronous>, transform_indices = @transform_7, window_bounds = array<i64: 1, 128>}, {transform_indices = @transform_8, window_bounds = array<i64: 128, 128>}]} {
    %c0_i32 = arith.constant 0 : i32
    %0 = arith.cmpi eq, %arg0, %c0_i32 : i32
    %c0_i32_0 = arith.constant 0 : i32
    %1 = arith.cmpi eq, %arg1, %c0_i32_0 : i32
    %2 = arith.andi %0, %1 : i1
    %c0_i32_1 = arith.constant 0 : i32
    %3 = arith.cmpi eq, %arg2, %c0_i32_1 : i32
    %4 = arith.andi %2, %3 : i1
    %5 = arith.extui %4 : i1 to i32
    %c0_i32_2 = arith.constant 0 : i32
    %6 = arith.cmpi ne, %5, %c0_i32_2 : i32
    scf.if %6 {
      %c0_12 = arith.constant 0 : index
      %c0_13 = arith.constant 0 : index
      %25 = vector.load %arg3[%c0_12, %c0_13] : memref<256x16xbf16, #tpu.memory_space<vmem>>, vector<256x16xbf16>
      %c0_14 = arith.constant 0 : index
      %c0_15 = arith.constant 0 : index
      %26 = vector.load %arg5[%c0_14, %c0_15] : memref<16x128xbf16, #tpu.memory_space<vmem>>, vector<16x128xbf16>
      %cst = arith.constant dense<0.000000e+00> : vector<256x128xf32>
      %27 = tpu.matmul %25, %26, %cst {dimension_numbers = #tpu.dot_dimension_numbers<[1], [0], [0], [1], [0, 0, 1, 1], [], []>} : vector<256x16xbf16>, vector<16x128xbf16>, vector<256x128xf32> -> vector<256x128xf32>
      %28 = arith.truncf %27 : vector<256x128xf32> to vector<256x128xbf16>
      %c0_16 = arith.constant 0 : index
      %c0_17 = arith.constant 0 : index
      %29 = vector.load %arg12[%c0_16, %c0_17] : memref<256x128xbf16, #tpu.memory_space<vmem>>, vector<256x128xbf16>
      tpu.vector_store %arg12[%c0_16, %c0_17], %28 {strides = array<i32>} : memref<256x128xbf16, #tpu.memory_space<vmem>>, vector<256x128xbf16>,
    } else {
    }
    %c0_i32_3 = arith.constant 0 : i32
    %7 = arith.cmpi eq, %arg2, %c0_i32_3 : i32
    %8 = arith.extui %7 : i1 to i32
    %c0_i32_4 = arith.constant 0 : i32
    %9 = arith.cmpi ne, %8, %c0_i32_4 : i32
    scf.if %9 {
      %cst = arith.constant 0.000000e+00 : f32
      %25 = vector.broadcast %cst : f32 to vector<128x128xf32>
      %c0_12 = arith.constant 0 : index
      %c0_13 = arith.constant 0 : index
      %26 = vector.load %arg15[%c0_12, %c0_13] : memref<128x128xf32, #tpu.memory_space<vmem>>, vector<128x128xf32>
      tpu.vector_store %arg15[%c0_12, %c0_13], %25 {strides = array<i32>} : memref<128x128xf32, #tpu.memory_space<vmem>>, vector<128x128xf32>,
    } else {
    }
    %c0 = arith.constant 0 : index
    %c0_5 = arith.constant 0 : index
    %10 = vector.load %arg4[%c0, %c0_5] : memref<128x128xbf16, #tpu.memory_space<vmem>>, vector<128x128xbf16>
    %c128_i32 = arith.constant 128 : i32
    %11 = arith.muli %arg2, %c128_i32 : i32
    %12 = tpu.assume_multiple %11, 128 : i32
    %c0_i32_6 = arith.constant 0 : i32
    %13 = arith.cmpi eq, %arg0, %c0_i32_6 : i32
    %14 = arith.extui %13 : i1 to i32
    %c0_i32_7 = arith.constant 0 : i32
    %15 = arith.cmpi ne, %14, %c0_i32_7 : i32
    scf.if %15 {
      %c0_12 = arith.constant 0 : index
      %c0_13 = arith.constant 0 : index
      %25 = vector.load %arg15[%c0_12, %c0_13] : memref<128x128xf32, #tpu.memory_space<vmem>>, vector<128x128xf32>
      %26 = arith.index_cast %12 : i32 to index
      %c0_14 = arith.constant 0 : index
      %27 = vector.load %arg12[%26, %c0_14] : memref<256x128xbf16, #tpu.memory_space<vmem>>, vector<128x128xbf16>
      %cst = arith.constant dense<0.000000e+00> : vector<128x128xf32>
      %28 = tpu.matmul %10, %27, %cst {dimension_numbers = #tpu.dot_dimension_numbers<[1], [0], [0], [1], [0, 0, 1, 1], [], []>} : vector<128x128xbf16>, vector<128x128xbf16>, vector<128x128xf32> -> vector<128x128xf32>
      %29 = arith.addf %25, %28 : vector<128x128xf32>
      %c0_15 = arith.constant 0 : index
      %c0_16 = arith.constant 0 : index
      %30 = vector.load %arg15[%c0_15, %c0_16] : memref<128x128xf32, #tpu.memory_space<vmem>>, vector<128x128xf32>
      tpu.vector_store %arg15[%c0_15, %c0_16], %29 {strides = array<i32>} : memref<128x128xf32, #tpu.memory_space<vmem>>, vector<128x128xf32>,
    } else {
    }
    %c1_i32 = arith.constant 1 : i32
    %16 = arith.cmpi eq, %arg0, %c1_i32 : i32
    %17 = arith.extui %16 : i1 to i32
    %c0_i32_8 = arith.constant 0 : i32
    %18 = arith.cmpi ne, %17, %c0_i32_8 : i32
    scf.if %18 {
      %c0_12 = arith.constant 0 : index
      %c0_13 = arith.constant 0 : index
      %25 = vector.load %arg15[%c0_12, %c0_13] : memref<128x128xf32, #tpu.memory_space<vmem>>, vector<128x128xf32>
      %26 = arith.index_cast %12 : i32 to index
      %c0_14 = arith.constant 0 : index
      %27 = vector.load %arg13[%26, %c0_14] : memref<256x128xbf16, #tpu.memory_space<vmem>>, vector<128x128xbf16>
      %cst = arith.constant dense<0.000000e+00> : vector<128x128xf32>
      %28 = tpu.matmul %10, %27, %cst {dimension_numbers = #tpu.dot_dimension_numbers<[1], [0], [0], [1], [0, 0, 1, 1], [], []>} : vector<128x128xbf16>, vector<128x128xbf16>, vector<128x128xf32> -> vector<128x128xf32>
      %29 = arith.addf %25, %28 : vector<128x128xf32>
      %c0_15 = arith.constant 0 : index
      %c0_16 = arith.constant 0 : index
      %30 = vector.load %arg15[%c0_15, %c0_16] : memref<128x128xf32, #tpu.memory_space<vmem>>, vector<128x128xf32>
      tpu.vector_store %arg15[%c0_15, %c0_16], %29 {strides = array<i32>} : memref<128x128xf32, #tpu.memory_space<vmem>>, vector<128x128xf32>,
    } else {
    }
    %c2_i32 = arith.constant 2 : i32
    %19 = arith.cmpi eq, %arg0, %c2_i32 : i32
    %20 = arith.extui %19 : i1 to i32
    %c0_i32_9 = arith.constant 0 : i32
    %21 = arith.cmpi ne, %20, %c0_i32_9 : i32
    scf.if %21 {
      %c0_12 = arith.constant 0 : index
      %c0_13 = arith.constant 0 : index
      %25 = vector.load %arg15[%c0_12, %c0_13] : memref<128x128xf32, #tpu.memory_space<vmem>>, vector<128x128xf32>
      %26 = arith.index_cast %12 : i32 to index
      %c0_14 = arith.constant 0 : index
      %27 = vector.load %arg14[%26, %c0_14] : memref<256x128xbf16, #tpu.memory_space<vmem>>, vector<128x128xbf16>
      %cst = arith.constant dense<0.000000e+00> : vector<128x128xf32>
      %28 = tpu.matmul %10, %27, %cst {dimension_numbers = #tpu.dot_dimension_numbers<[1], [0], [0], [1], [0, 0, 1, 1], [], []>} : vector<128x128xbf16>, vector<128x128xbf16>, vector<128x128xf32> -> vector<128x128xf32>
      %29 = arith.addf %25, %28 : vector<128x128xf32>
      %c0_15 = arith.constant 0 : index
      %c0_16 = arith.constant 0 : index
      %30 = vector.load %arg15[%c0_15, %c0_16] : memref<128x128xf32, #tpu.memory_space<vmem>>, vector<128x128xf32>
      tpu.vector_store %arg15[%c0_15, %c0_16], %29 {strides = array<i32>} : memref<128x128xf32, #tpu.memory_space<vmem>>, vector<128x128xf32>,
    } else {
    }
    %c1_i32_10 = arith.constant 1 : i32
    %22 = arith.cmpi eq, %arg2, %c1_i32_10 : i32
    %23 = arith.extui %22 : i1 to i32
    %c0_i32_11 = arith.constant 0 : i32
    %24 = arith.cmpi ne, %23, %c0_i32_11 : i32
    scf.if %24 {
      %c128_i32_12 = arith.constant 128 : i32
      %25 = arith.muli %arg1, %c128_i32_12 : i32
      %26 = tpu.assume_multiple %25, 128 : i32
      %c0_13 = arith.constant 0 : index
      %c0_14 = arith.constant 0 : index
      %27 = vector.load %arg15[%c0_13, %c0_14] : memref<128x128xf32, #tpu.memory_space<vmem>>, vector<128x128xf32>
      %c0_i32_15 = arith.constant 0 : i32
      %28 = arith.cmpi eq, %arg0, %c0_i32_15 : i32
      %29 = arith.extui %28 : i1 to i32
      %c0_i32_16 = arith.constant 0 : i32
      %30 = arith.cmpi ne, %29, %c0_i32_16 : i32
      scf.if %30 {
        %c0_21 = arith.constant 0 : index
        %c0_22 = arith.constant 0 : index
        %37 = vector.load %arg6[%c0_21, %c0_22] : memref<1x128xf32, #tpu.memory_space<vmem>>, vector<1x128xf32>
        %38 = vector.broadcast %37 : vector<1x128xf32> to vector<128x128xf32>
        %39 = arith.addf %27, %38 : vector<128x128xf32>
        %cst = arith.constant 0.000000e+00 : f32
        %40 = vector.broadcast %cst : f32 to vector<128x128xf32>
        %41 = arith.maximumf %39, %40 : vector<128x128xf32>
        %42 = arith.truncf %41 : vector<128x128xf32> to vector<128x128xbf16>
        %43 = arith.index_cast %26 : i32 to index
        %c0_23 = arith.constant 0 : index
        %44 = vector.load %arg13[%43, %c0_23] : memref<256x128xbf16, #tpu.memory_space<vmem>>, vector<128x128xbf16>
        tpu.vector_store %arg13[%43, %c0_23], %42 {strides = array<i32>} : memref<256x128xbf16, #tpu.memory_space<vmem>>, vector<128x128xbf16>,
      } else {
      }
      %c1_i32_17 = arith.constant 1 : i32
      %31 = arith.cmpi eq, %arg0, %c1_i32_17 : i32
      %32 = arith.extui %31 : i1 to i32
      %c0_i32_18 = arith.constant 0 : i32
      %33 = arith.cmpi ne, %32, %c0_i32_18 : i32
      scf.if %33 {
        %37 = arith.truncf %27 : vector<128x128xf32> to vector<128x128xbf16>
        %c0_21 = arith.constant 0 : index
        %c0_22 = arith.constant 0 : index
        %38 = vector.load %arg7[%c0_21, %c0_22] : memref<128x128xbf16, #tpu.memory_space<vmem>>, vector<128x128xbf16>
        %cst = arith.constant dense<0.000000e+00> : vector<128x128xf32>
        %39 = tpu.matmul %37, %38, %cst {dimension_numbers = #tpu.dot_dimension_numbers<[1], [0], [0], [1], [0, 0, 1, 1], [], []>} : vector<128x128xbf16>, vector<128x128xbf16>, vector<128x128xf32> -> vector<128x128xf32>
        %c0_23 = arith.constant 0 : index
        %c0_24 = arith.constant 0 : index
        %40 = vector.load %arg8[%c0_23, %c0_24] : memref<1x128xf32, #tpu.memory_space<vmem>>, vector<1x128xf32>
        %41 = vector.broadcast %40 : vector<1x128xf32> to vector<128x128xf32>
        %42 = arith.addf %39, %41 : vector<128x128xf32>
        %43 = arith.truncf %42 : vector<128x128xf32> to vector<128x128xbf16>
        %44 = arith.index_cast %26 : i32 to index
        %c0_25 = arith.constant 0 : index
        %45 = vector.load %arg14[%44, %c0_25] : memref<256x128xbf16, #tpu.memory_space<vmem>>, vector<128x128xbf16>
        tpu.vector_store %arg14[%44, %c0_25], %43 {strides = array<i32>} : memref<256x128xbf16, #tpu.memory_space<vmem>>, vector<128x128xbf16>,
      } else {
      }
      %c2_i32_19 = arith.constant 2 : i32
      %34 = arith.cmpi eq, %arg0, %c2_i32_19 : i32
      %35 = arith.extui %34 : i1 to i32
      %c0_i32_20 = arith.constant 0 : i32
      %36 = arith.cmpi ne, %35, %c0_i32_20 : i32
      scf.if %36 {
        %37 = arith.truncf %27 : vector<128x128xf32> to vector<128x128xbf16>
        %c0_21 = arith.constant 0 : index
        %c0_22 = arith.constant 0 : index
        %38 = vector.load %arg9[%c0_21, %c0_22] : memref<128x128xbf16, #tpu.memory_space<vmem>>, vector<128x128xbf16>
        %cst = arith.constant dense<0.000000e+00> : vector<128x128xf32>
        %39 = tpu.matmul %37, %38, %cst {dimension_numbers = #tpu.dot_dimension_numbers<[1], [0], [0], [1], [0, 0, 1, 1], [], []>} : vector<128x128xbf16>, vector<128x128xbf16>, vector<128x128xf32> -> vector<128x128xf32>
        %c0_23 = arith.constant 0 : index
        %c0_24 = arith.constant 0 : index
        %40 = vector.load %arg10[%c0_23, %c0_24] : memref<1x128xf32, #tpu.memory_space<vmem>>, vector<1x128xf32>
        %41 = vector.broadcast %40 : vector<1x128xf32> to vector<128x128xf32>
        %42 = arith.addf %39, %41 : vector<128x128xf32>
        %43 = tpu.iota {dimensions = array<i32: 1>} : vector<128x128xi32>
        %c8_i32 = arith.constant 8 : i32
        %44 = vector.broadcast %c8_i32 : i32 to vector<128x128xi32>
        %45 = arith.cmpi slt, %43, %44 : vector<128x128xi32>
        %cst_25 = arith.constant 0xFF800000 : f32
        %46 = vector.broadcast %cst_25 : f32 to vector<128x128xf32>
        %47 = arith.select %45, %42, %46 : vector<128x128xi1>, vector<128x128xf32>
        %cst_26 = arith.constant dense<0xFF800000> : vector<128xf32>
        %48 = vector.multi_reduction <maximumf>, %47, %cst_26 [1] : vector<128x128xf32> to vector<128xf32>
        %49 = vector.shape_cast %48 : vector<128xf32> to vector<128x1xf32>
        %50 = vector.broadcast %49 : vector<128x1xf32> to vector<128x128xf32>
        %51 = arith.subf %47, %50 : vector<128x128xf32>
        %52 = math.exp %51 : vector<128x128xf32>
        %cst_27 = arith.constant dense<0.000000e+00> : vector<128xf32>
        %53 = vector.multi_reduction <add>, %52, %cst_27 [1] : vector<128x128xf32> to vector<128xf32>
        %54 = vector.shape_cast %53 : vector<128xf32> to vector<128x1xf32>
        %55 = math.log %54 : vector<128x1xf32>
        %56 = vector.broadcast %55 : vector<128x1xf32> to vector<128x128xf32>
        %57 = arith.subf %51, %56 : vector<128x128xf32>
        %cst_28 = arith.constant 0.000000e+00 : f32
        %58 = vector.broadcast %cst_28 : f32 to vector<128x128xf32>
        %59 = arith.select %45, %57, %58 : vector<128x128xi1>, vector<128x128xf32>
        %c0_29 = arith.constant 0 : index
        %c0_30 = arith.constant 0 : index
        %60 = vector.load %arg11[%c0_29, %c0_30] : memref<128x128xf32, #tpu.memory_space<vmem>>, vector<128x128xf32>
        tpu.vector_store %arg11[%c0_29, %c0_30], %59 {strides = array<i32>} : memref<128x128xf32, #tpu.memory_space<vmem>>, vector<128x128xf32>,
      } else {
      }
    } else {
    }
    return
  }
  func.func @transform_0(%arg0: i32, %arg1: i32, %arg2: i32) -> (i32, i32) {
    %c0_i32 = arith.constant 0 : i32
    %c0_i32_0 = arith.constant 0 : i32
    %c0_i32_1 = arith.constant 0 : i32
    return %c0_i32, %c0_i32_0 : i32, i32
  }
  func.func @transform_1(%arg0: i32, %arg1: i32, %arg2: i32) -> (i32, i32) {
    %c0_i32 = arith.constant 0 : i32
    return %arg1, %arg2 : i32, i32
  }
  func.func @transform_2(%arg0: i32, %arg1: i32, %arg2: i32) -> (i32, i32) {
    %c0_i32 = arith.constant 0 : i32
    %c0_i32_0 = arith.constant 0 : i32
    %c0_i32_1 = arith.constant 0 : i32
    return %c0_i32, %c0_i32_0 : i32, i32
  }
  func.func @transform_3(%arg0: i32, %arg1: i32, %arg2: i32) -> (i32, i32) {
    %c0_i32 = arith.constant 0 : i32
    %c0_i32_0 = arith.constant 0 : i32
    %c0_i32_1 = arith.constant 0 : i32
    return %c0_i32, %c0_i32_0 : i32, i32
  }
  func.func @transform_4(%arg0: i32, %arg1: i32, %arg2: i32) -> (i32, i32) {
    %c0_i32 = arith.constant 0 : i32
    %c0_i32_0 = arith.constant 0 : i32
    %c0_i32_1 = arith.constant 0 : i32
    return %c0_i32, %c0_i32_0 : i32, i32
  }
  func.func @transform_5(%arg0: i32, %arg1: i32, %arg2: i32) -> (i32, i32) {
    %c0_i32 = arith.constant 0 : i32
    %c0_i32_0 = arith.constant 0 : i32
    %c0_i32_1 = arith.constant 0 : i32
    return %c0_i32, %c0_i32_0 : i32, i32
  }
  func.func @transform_6(%arg0: i32, %arg1: i32, %arg2: i32) -> (i32, i32) {
    %c0_i32 = arith.constant 0 : i32
    %c0_i32_0 = arith.constant 0 : i32
    %c0_i32_1 = arith.constant 0 : i32
    return %c0_i32, %c0_i32_0 : i32, i32
  }
  func.func @transform_7(%arg0: i32, %arg1: i32, %arg2: i32) -> (i32, i32) {
    %c0_i32 = arith.constant 0 : i32
    %c0_i32_0 = arith.constant 0 : i32
    %c0_i32_1 = arith.constant 0 : i32
    return %c0_i32, %c0_i32_0 : i32, i32
  }
  func.func @transform_8(%arg0: i32, %arg1: i32, %arg2: i32) -> (i32, i32) {
    %c0_i32 = arith.constant 0 : i32
    %c0_i32_0 = arith.constant 0 : i32
    return %arg1, %c0_i32 : i32, i32
  }
}

</mosaic_0001>

<bundles_post_ra>
// kernel: tpu_custom_call.1
= control target key start
LH: loop header
LB: loop body
LE: loop exit
PB: predicated region body
PF: predicated region fallthrough
CT: control target
= control target key end

     0   :  { %s4633_s0 = inlined_call_operand.vmem [shape: bf16[256,16], index: 0, kind: input, shape index: {}]   ;;  %s4634_s1 = inlined_call_operand.hbm [shape: bf16[256,256], index: 1, kind: input, shape index: {}]   ;;  %s4635_s2 = inlined_call_operand.vmem [shape: bf16[16,128], index: 2, kind: input, shape index: {}]   ;;  %s4636_s3 = inlined_call_operand.vmem [shape: f32[1,128], index: 3, kind: input, shape index: {}]   ;;  %s4637_s4 = inlined_call_operand.vmem [shape: bf16[128,128], index: 4, kind: input, shape index: {}]   ;;  %s4638_s5 = inlined_call_operand.vmem [shape: f32[1,128], index: 5, kind: input, shape index: {}]   ;;  %s4639_s6 = inlined_call_operand.vmem [shape: bf16[128,128], index: 6, kind: input, shape index: {}]   ;;  %s4640_s7 = inlined_call_operand.vmem [shape: f32[1,128], index: 7, kind: input, shape index: {}]   ;;  %s4641_s8 = inlined_call_operand.hbm [shape: f32[256,128], index: 8, kind: output, shape index: {}]  }
   0x1   :  { %4652 = sst [smem:[#allocation22_spill]] %s4640_s7 }
   0x2   :  { %4653 = sst [smem:[#allocation23_spill]] %s4641_s8 }
   0x3   :  { %13 = vsyncpa [#allocation7], 0 }
   0x4   :  { %15 = vsyncpa [#allocation7 + $0x1], 0 }
   0x5   :  { %16 = vsyncpa [#allocation8], 0 }
   0x6   :  { %18 = vsyncpa [#allocation8 + $0x1], 0  ;;  %s3882_s27 = smov 0   ;;  %s3884_s28 = smov 0  }
   0x7   :  { %s3886_s29 = smov 0   ;;  %s3888_s30 = smov 0  }
   0x8   :  { %s3890_s9 = smov 0   ;;  %s3892_s10 = smov 0  }
   0x9   :  { %s3894_s11 = smov 0   ;;  %s3896_s12 = smov 0  }
   0xa   :  { %s3898_s13 = smov 0   ;;  %s3900_s14 = smov 0  }
   0xb   :  { %s3902_s15 = smov 0   ;;  %s3904_s16 = smov 0  }
   0xc   :  { %s3906_s17 = smov 0  }
   0xd LB: > { %4654 = sst [smem:[#allocation12_spill]] %s3779_s27  ;;  %s4642_s18 = sadd.s32 4294967295, %s3827_s17   ;;  %s3827_s17 = sphi %s3906_s17, %s24_s17   ;;  %s3823_s16 = sphi %s3904_s16, %s4683_s16   ;;  %s3819_s15 = sphi %s3902_s15, %s4693_s15   ;;  %s3815_s14 = sphi %s3900_s14, %s4692_s14   ;;  %s3811_s13 = sphi %s3898_s13, %s4691_s13   ;;  %s3807_s12 = sphi %s3896_s12, %s4690_s12   ;;  %s3803_s11 = sphi %s3894_s11, %s4689_s11   ;;  %s3799_s10 = sphi %s3892_s10, %s4679_s10   ;;  %s3795_s9 = sphi %s3890_s9, %s4688_s9   ;;  %s3791_s30 = sphi %s3888_s30, %s4687_s30   ;;  %s3787_s29 = sphi %s3886_s29, %s4677_s29   ;;  %s3783_s28 = sphi %s3884_s28, %s4686_s28   ;;  %s3779_s27 = sphi %s3882_s27, %s4685_s27  }
   0xe   : > { %4655 = sst [smem:[#allocation13_spill]] %s3787_s29  ;;  %s36_s20 = sadd.s32 1, %s3815_s14 }
   0xf   : > { %4656 = sst [smem:[#allocation14_spill]] %s3799_s10  ;;  %s39_s21 = sadd.s32 1, %s3819_s15 }
  0x10   : > { %4657 = sst [smem:[#allocation15_spill]] %s3823_s16  ;;  %p37_p0 = scmp.ge.s32.totalorder %s36_s20, 2 }
  0x11   : > { %s43_s22 = sadd.s32 1, %s3823_s16  ;;  %s73_s23 = sadd.s32 1, %s3799_s10 }
  0x12   : > { %p80_p1 = scmp.ne.s32.totalorder %s3799_s10, %s3795_s9  ;;  %s4695_s20 = smov (%p37_p0, %s36_s20), 0 }
  0x13   : > { %4658 = sst [smem:[#allocation16_spill]] %s4695_s20  ;;  %s4697_s21 = smov (!%p37_p0, %s39_s21), %s3819_s15 }
  0x14   : > { %s69_s24 = ssub.s32 %s3815_s14, %s4695_s20  ;;  %p81_p2 = scmp.eq.s32.totalorder %s3827_s17, 0 }
  0x15   : > { %p41_p3 = scmp.ge.s32.totalorder %s4697_s21, 2  ;;  %p86_p4 = scmp.ne.s32.totalorder %s3795_s9, %s3791_s30 }
  0x16   : > { %p3963_p5 = por %p81_p2, %p80_p1  ;;  %p87_p6 = scmp.eq.s32.totalorder %s4642_s18, 0 }
  0x17   : > { %s4699_s21 = smov (%p41_p3, %s4697_s21), 0  ;;  %s4701_s22 = smov (!%p41_p3, %s43_s22), %s3823_s16 }
  0x18   : > { %4660 = sst [smem:[#allocation17_spill]] %s4699_s21  ;;  %s68_s26 = ssub.s32 %s3819_s15, %s4699_s21 }
  0x19   : > { %p3974_p7 = por %p87_p6, %p86_p4  ;;  %p45_p8 = scmp.ge.s32.totalorder %s4701_s22, 3 }
  0x1a   : > { %s70_s30 = sor.u32 %s69_s24, %s68_s26  ;;  %p223_p10 = scmp.eq.s32.totalorder %s68_s26, 0 }
  0x1b   : > { %p71_p9 = scmp.eq.s32.totalorder %s70_s30, 0  ;;  %s4703_s22 = smov (%p45_p8, %s4701_s22), 0 }
  0x1c   : > { %4662 = sst [smem:[#allocation18_spill]] %s4703_s22  ;;  %s225_s20 = sadd.s32 1, %s3787_s29 }
  0x1d   : > { %s3981_s18 = scalar_select %p71_p9, %s3799_s10, %s73_s23  }
  0x1e   : > { %p235_p11 = scmp.ne.s32.totalorder %s3787_s29, %s3783_s28  ;;  %s4665_s21 = sadd.s32 4294967295, %s3827_s17  }
  0x1f   : > { %4663 = sst [smem:[#allocation19_spill]] %s3981_s18  ;;  %p236_p12 = scmp.eq.s32.totalorder %s4665_s21, 11 }
  0x20   : > { %s3987_s16 = scalar_select %p223_p10, %s3787_s29, %s225_s20  }
  0x21   : > { %p241_p13 = scmp.ne.s32.totalorder %s3783_s28, %s3779_s27  ;;  %s4666_s8 = sadd.s32 4294967294, %s3827_s17  }
  0x22   : > { %4664 = sst [smem:[#allocation20_spill]] %s3987_s16  ;;  %p242_p0 = scmp.eq.s32.totalorder %s4666_s8, 11 }
  0x23   : > { %p3995_p1 = por %p236_p12, %p235_p11  ;;  %p3430_p2 = scmp.lt.s32.totalorder %s3827_s17, 12 }
  0x24   : > { %p4000_p3 = por %p242_p0, %p241_p13  ;;  %s283_s23 = sand.u32 1, %s3799_s10  }
  0x25   : > { %s4667_s24 = scalar_select %p3995_p1, 1, 0 }
  0x26   : > { %s2599_s30 = sshll.u32 %s283_s23, 6  ;;  %s2790_s22 = sshll.u32 %s3819_s15, 5 }
  0x27   : > { %4668 = sst [smem:[#allocation21_spill]] %s4667_s24  ;;  %s293_s20 = sadd.s32 %s3815_s14, %s2790_s22 }
  0x28   : > { %s287_s18 = scalar_lea.vmem [#allocation6], %s2599_s30  ;;  %s2602_s29 = sshll.u32 %s293_s20, 6 }
  0x29   : > { %s296_s16 = sshll.u32 %s287_s18, 4  ;;  %s295_s8 = scalar_lea.hbm %s4634_s1, %s2602_s29  ;;  %s297_s16 = int_to_ptr.vmem [resolvable:$true] %s296_s16 }
  0x2a   : > { %p4012_p4 = pnand %p3430_p2, %p3963_p5  ;;  %s284_s7 = scalar_lea.sflag [#allocation7], %s283_s23 }
  0x2b   : > { %s3676_s10 = scalar_lea.vmem %s297_s16, 1024  ;;  %s3829_s18 = smov [#allocation6]  }
  0x2c   : > { %p3665_p6 = pneg %p4012_p4  ;;  %p3677_p8 = scmp.ne.s32.totalorder %s297_s16, %s3676_s10 }
  0x2d   : > { %s3681_s22 = sshll.u32 %s3829_s18, 4  ;;  %s3682_s22 = int_to_ptr.vmem [resolvable:$false] %s3681_s22 }
  0x2e   : > { %p3679_p9 = pnand %p3677_p8, %p3665_p6  ;;  %s3683_s30 = scalar_lea.vmem %s3682_s22, 2048 }
  0x2f   : > { %p3684_p11 = scmp.lt.s32.totalorder %s297_s16, %s3682_s22  ;;  %p3685_p12 = scmp.lt.s32.totalorder %s3683_s30, %s3676_s10 }
  0x30   : > { %p3680_p10 = pneg %p3679_p9 }
  0x31   : > { %p3686_p13 = por %p3685_p12, %p3684_p11 }
  0x33   : > { %p3687_p0 = pnand %p3686_p13, %p3680_p10 }
  0x35   : > { %3690 = shalt.err (!%p3687_p0)
}
  0x36   : > { %s3830_s27 = smov 128   ;;  %s3831_s29 = smov 64  }
  0x37   : > { %s3832_s25 = smov 4   ;;  %p2603_p5 = scmp.ge.s32.totalorder %s3827_s17, 1 }
  0x38   : > { %3425 = dma.hbm_to_vmem [thread:$0]  (!%p4012_p4), %s295_s8, 1024, %s297_s16, %s284_s7, %s3830_s27, %s3831_s29, %s3832_s25  }
  0x39   : > { %p304_p2 = scmp.lt.s32.totalorder %s3827_s17, 13 }
  0x3b   : > { %p305_p6 = pnand %p2603_p5, %p304_p2 }
  0x3c   : > { %s310_s23 = sand.u32 (!%p305_p6), 1, %s3795_s9  }
  0x3d   : > { %308 = sbr.rel (%p305_p6) target bundleno = 1968 (0x7b0), region = 52  ;;  %s2604_s20 = sshll.u32 (!%p305_p6), %s310_s23, 6 }
  0x3e   : > { %s311_s10 = scalar_lea.sflag (!%p305_p6), [#allocation7], %s310_s23  ;;  %s4023_s21 = scalar_lea.vmem (!%p305_p6), [#allocation6], %s2604_s20 }
  0x42   : > { %3770 = dma.done.wait (%p3974_p7), %s311_s10, 1024  }
  0x43   : > { %3772 = vsyncadd (%p3974_p7), %s311_s10, 4294966272  ;;  %s344_s7 = sand.u32 1, %s3783_s28   ;;  %p350_p4 = scmp.eq.s32.totalorder %s3811_s13, 0 }
  0x44   : > { %s2605_s16 = sshll.u32 %s344_s7, 7  ;;  %p351_p8 = scmp.eq.s32.totalorder %s3807_s12, 0 }
  0x45   : > { %p354_p10 = scmp.eq.s32.totalorder %s3803_s11, 0  ;;  %s4035_s24 = scalar_lea.vmem [#allocation9], %s2605_s16 }
  0x46   : > { %p352_p9 = pnand %p351_p8, %p350_p4 }
  0x48   : > { %p353_p11 = pneg %p352_p9 }
  0x4a   : > { %p355_p12 = pnand %p354_p10, %p353_p11 }
  0x4c   : > { %358 = sbr.rel (%p355_p12) target bundleno = 312 (0x138), region = 60 }
  0x51   : > { %v3542_v0 = vld [vmem:[%s4635_s2] sm:$0xff]   ;;  %vm479_vm0 = vcmask 130048   ;;  %v3545_v3 = vld [vmem:[%s4633_s0 + $0x8] sm:$0xff]   ;;  %v3547_v5 = vld [vmem:[%s4633_s0 + $0x10] sm:$0xff]  }
  0x52   : > { %v3543_v1 = vld [vmem:[%s4633_s0] sm:$0xff]   ;;  %3142 = vmatprep.subr.bf16.mxu0 %v3542_v0  ;;  %3336 = vmatprep.subr.bf16.mxu1 %v3542_v0  ;;  %v3546_v4 = vld [vmem:[%s4633_s0 + $0x48] sm:$0xff]   ;;  %v3548_v6 = vld [vmem:[%s4633_s0 + $0x50] sm:$0xff]  }
  0x53   : > { %v3544_v2 = vld [vmem:[%s4633_s0 + $0x40] sm:$0xff]   ;;  %3143 = vmatpush3.bf16.msra.mxu0 %v3542_v0  ;;  %3337 = vmatpush3.bf16.msra.mxu1 %v3542_v0  ;;  %v3549_v7 = vld [vmem:[%s4633_s0 + $0x18] sm:$0xff]   ;;  %v3553_v11 = vld [vmem:[%s4633_s0 + $0x28] sm:$0xff]  }
  0x54   : > { %3144 = vmatprep.mubr.msk.bf16.mxu0 %vm479_vm0, %v3543_v1  ;;  %3160 = vmatprep.mubr.msk.bf16.mxu1 %vm479_vm0, %v3544_v2  ;;  %v3550_v8 = vld [vmem:[%s4633_s0 + $0x58] sm:$0xff]   ;;  %v3551_v9 = vld [vmem:[%s4633_s0 + $0x20] sm:$0xff]   ;;  %v3554_v12 = vld [vmem:[%s4633_s0 + $0x68] sm:$0xff]  }
  0x55   : > { %v3552_v10 = vld [vmem:[%s4633_s0 + $0x60] sm:$0xff]   ;;  %v3555_v13 = vld [vmem:[%s4633_s0 + $0x30] sm:$0xff]   ;;  %v3557_v15 = vld [vmem:[%s4633_s0 + $0x38] sm:$0xff]  }
  0x56   : > { %3145 = vmatmul.mubr.msk.bf16.vlgmr.msra.gmra.mxu0 %vm479_vm0, %v3545_v3  ;;  %3161 = vmatmul.mubr.msk.bf16.vlgmr.msra.gmra.mxu1 %vm479_vm0, %v3546_v4  ;;  %v3556_v14 = vld [vmem:[%s4633_s0 + $0x70] sm:$0xff]   ;;  %v3558_v16 = vld [vmem:[%s4633_s0 + $0x78] sm:$0xff]  }
  0x57   : > { %3148 = vmatprep.mubr.msk.bf16.mxu0 %vm479_vm0, %v3547_v5  ;;  %3164 = vmatprep.mubr.msk.bf16.mxu1 %vm479_vm0, %v3548_v6 }
  0x5e   : > { %3149 = vmatmul.mubr.msk.bf16.gmra.mxu0 %vm479_vm0, %v3549_v7  ;;  %3165 = vmatmul.mubr.msk.bf16.gmra.mxu1 %vm479_vm0, %v3550_v8 }
  0x5f   : > { %3152 = vmatprep.mubr.msk.bf16.mxu0 %vm479_vm0, %v3551_v9  ;;  %3168 = vmatprep.mubr.msk.bf16.mxu1 %vm479_vm0, %v3552_v10 }
  0x66   : > { %3153 = vmatmul.mubr.msk.bf16.gmra.mxu0 %vm479_vm0, %v3553_v11  ;;  %3169 = vmatmul.mubr.msk.bf16.gmra.mxu1 %vm479_vm0, %v3554_v12 }
  0x67   : > { %3156 = vmatprep.mubr.msk.bf16.mxu0 %vm479_vm0, %v3555_v13  ;;  %3172 = vmatprep.mubr.msk.bf16.mxu1 %vm479_vm0, %v3556_v14 }
  0x6e   : > { %3157 = vmatmul.mubr.msk.bf16.gmra.mxu0 %vm479_vm0, %v3557_v15  ;;  %3173 = vmatmul.mubr.msk.bf16.gmra.mxu1 %vm479_vm0, %v3558_v16 }
 0x116   : > { %v3146_v17 = vpop.f32.mrf.mxu0  ;;  %v3162_v18 = vpop.f32.mrf.mxu1 }
 0x118   : > { %v562_v19 = vpop.f32.mrf.mxu0  ;;  %v626_v20 = vpop.f32.mrf.mxu1 }
 0x11a   : > { %v3147_v21 = vpop.f32.mrf.mxu0  ;;  %v3163_v22 = vpop.f32.mrf.mxu1 }
 0x11b   : > { %v2864_v23 = vpack.c.bf16 %v3147_v21, %v3146_v17  ;;  %v2904_v24 = vpack.c.bf16 %v3163_v22, %v3162_v18 }
 0x11c   : > { %v565_v25 = vpop.f32.mrf.mxu0  ;;  %v629_v26 = vpop.f32.mrf.mxu1 }
 0x11d   : > { %3016 = vst [vmem:[#allocation2 + $0x8] sm:$0xff] %v2864_v23   ;;  %3024 = vst [vmem:[#allocation2 + $0x48] sm:$0xff] %v2904_v24   ;;  %v2859_v27 = vpack.c.bf16 %v565_v25, %v562_v19  ;;  %v2899_v28 = vpack.c.bf16 %v629_v26, %v626_v20 }
 0x11e   : > { %v3150_v29 = vpop.f32.mrf.mxu0  ;;  %v3166_v30 = vpop.f32.mrf.mxu1 }
 0x11f   : > { %2860 = vst [vmem:[#allocation2] sm:$0xff] %v2859_v27   ;;  %3023 = vst [vmem:[#allocation2 + $0x40] sm:$0xff] %v2899_v28  }
 0x120   : > { %v578_v31 = vpop.f32.mrf.mxu0  ;;  %v642_v32 = vpop.f32.mrf.mxu1 }
 0x122   : > { %v3151_v33 = vpop.f32.mrf.mxu0  ;;  %v3167_v34 = vpop.f32.mrf.mxu1 }
 0x123   : > { %v2874_v35 = vpack.c.bf16 %v3151_v33, %v3150_v29  ;;  %v2914_v36 = vpack.c.bf16 %v3167_v34, %v3166_v30 }
 0x124   : > { %v581_v37 = vpop.f32.mrf.mxu0  ;;  %v645_v38 = vpop.f32.mrf.mxu1 }
 0x125   : > { %3018 = vst [vmem:[#allocation2 + $0x18] sm:$0xff] %v2874_v35   ;;  %3026 = vst [vmem:[#allocation2 + $0x58] sm:$0xff] %v2914_v36   ;;  %v2869_v39 = vpack.c.bf16 %v581_v37, %v578_v31  ;;  %v2909_v40 = vpack.c.bf16 %v645_v38, %v642_v32 }
 0x126   : > { %v3154_v41 = vpop.f32.mrf.mxu0  ;;  %v3170_v42 = vpop.f32.mrf.mxu1 }
 0x127   : > { %3017 = vst [vmem:[#allocation2 + $0x10] sm:$0xff] %v2869_v39   ;;  %3025 = vst [vmem:[#allocation2 + $0x50] sm:$0xff] %v2909_v40  }
 0x128   : > { %v594_v43 = vpop.f32.mrf.mxu0  ;;  %v658_v44 = vpop.f32.mrf.mxu1 }
 0x12a   : > { %v3155_v45 = vpop.f32.mrf.mxu0  ;;  %v3171_v46 = vpop.f32.mrf.mxu1 }
 0x12b   : > { %v2884_v47 = vpack.c.bf16 %v3155_v45, %v3154_v41  ;;  %v2924_v48 = vpack.c.bf16 %v3171_v46, %v3170_v42 }
 0x12c   : > { %v597_v49 = vpop.f32.mrf.mxu0  ;;  %v661_v50 = vpop.f32.mrf.mxu1 }
 0x12d   : > { %3020 = vst [vmem:[#allocation2 + $0x28] sm:$0xff] %v2884_v47   ;;  %3028 = vst [vmem:[#allocation2 + $0x68] sm:$0xff] %v2924_v48   ;;  %v2879_v51 = vpack.c.bf16 %v597_v49, %v594_v43  ;;  %v2919_v52 = vpack.c.bf16 %v661_v50, %v658_v44 }
 0x12e   : > { %v3158_v53 = vpop.f32.mrf.mxu0  ;;  %v3174_v54 = vpop.f32.mrf.mxu1 }
 0x12f   : > { %3019 = vst [vmem:[#allocation2 + $0x20] sm:$0xff] %v2879_v51   ;;  %3027 = vst [vmem:[#allocation2 + $0x60] sm:$0xff] %v2919_v52  }
 0x130   : > { %v610_v55 = vpop.f32.mrf.mxu0  ;;  %v674_v56 = vpop.f32.mrf.mxu1 }
 0x132   : > { %v3159_v57 = vpop.f32.mrf.mxu0  ;;  %v3175_v58 = vpop.f32.mrf.mxu1 }
 0x133   : > { %v2894_v59 = vpack.c.bf16 %v3159_v57, %v3158_v53  ;;  %v2934_v60 = vpack.c.bf16 %v3175_v58, %v3174_v54 }
 0x134   : > { %v613_v61 = vpop.f32.mrf.mxu0  ;;  %v677_v62 = vpop.f32.mrf.mxu1 }
 0x135   : > { %3022 = vst [vmem:[#allocation2 + $0x38] sm:$0xff] %v2894_v59   ;;  %3030 = vst [vmem:[#allocation2 + $0x78] sm:$0xff] %v2934_v60   ;;  %v2889_v63 = vpack.c.bf16 %v613_v61, %v610_v55  ;;  %v2929_v0 = vpack.c.bf16 %v677_v62, %v674_v56 }
 0x137   : > { %3021 = vst [vmem:[#allocation2 + $0x30] sm:$0xff] %v2889_v63   ;;  %3029 = vst [vmem:[#allocation2 + $0x70] sm:$0xff] %v2929_v0  }
 0x138 PF: > { %p2671_p7 = scmp.ne.s32.totalorder %s3803_s11, 0 }
 0x13a   : > { %851 = sbr.rel (%p2671_p7) target bundleno = 328 (0x148), region = 64 }
 0x13f   : > { %v3833_v1 = vmov 0.0  }
 0x140   : > { %852 = vst [vmem:[#allocation5 + $0x30] sm:$0xff] %v3833_v1  ;;  %853 = vst [vmem:[#allocation5] sm:$0xff] %v3833_v1 }
 0x141   : > { %854 = vst [vmem:[#allocation5 + $0x58] sm:$0xff] %v3833_v1  ;;  %855 = vst [vmem:[#allocation5 + $0x18] sm:$0xff] %v3833_v1 }
 0x142   : > { %856 = vst [vmem:[#allocation5 + $0x50] sm:$0xff] %v3833_v1  ;;  %857 = vst [vmem:[#allocation5 + $0x68] sm:$0xff] %v3833_v1 }
 0x143   : > { %858 = vst [vmem:[#allocation5 + $0x8] sm:$0xff] %v3833_v1  ;;  %859 = vst [vmem:[#allocation5 + $0x48] sm:$0xff] %v3833_v1 }
 0x144   : > { %860 = vst [vmem:[#allocation5 + $0x40] sm:$0xff] %v3833_v1  ;;  %861 = vst [vmem:[#allocation5 + $0x20] sm:$0xff] %v3833_v1 }
 0x145   : > { %862 = vst [vmem:[#allocation5 + $0x10] sm:$0xff] %v3833_v1  ;;  %863 = vst [vmem:[#allocation5 + $0x38] sm:$0xff] %v3833_v1 }
 0x146   : > { %864 = vst [vmem:[#allocation5 + $0x60] sm:$0xff] %v3833_v1  ;;  %865 = vst [vmem:[#allocation5 + $0x70] sm:$0xff] %v3833_v1 }
 0x147   : > { %866 = vst [vmem:[#allocation5 + $0x78] sm:$0xff] %v3833_v1  ;;  %867 = vst [vmem:[#allocation5 + $0x28] sm:$0xff] %v3833_v1 }
 0x148 PF: > { %v4106_v2 = vld [vmem:[%s4023_s21] sm:$0xf]  ;;  %v4109_v3 = vld [vmem:[%s4023_s21 + $0x4] sm:$0xf]  ;;  %v4112_v4 = vld [vmem:[%s4023_s21 + $0x8] sm:$0xf] }
 0x149   : > { %v4115_v5 = vld [vmem:[%s4023_s21 + $0xc] sm:$0xf]  ;;  %v4118_v6 = vld [vmem:[%s4023_s21 + $0x10] sm:$0xf]  ;;  %v4121_v7 = vld [vmem:[%s4023_s21 + $0x14] sm:$0xf] }
 0x14a   : > { %v4124_v8 = vld [vmem:[%s4023_s21 + $0x18] sm:$0xf]  ;;  %v4127_v9 = vld [vmem:[%s4023_s21 + $0x1c] sm:$0xf]  ;;  %v4130_v10 = vld [vmem:[%s4023_s21 + $0x20] sm:$0xf] }
 0x14b   : > { %v4133_v11 = vld [vmem:[%s4023_s21 + $0x24] sm:$0xf]  ;;  %v4136_v12 = vld [vmem:[%s4023_s21 + $0x28] sm:$0xf]  ;;  %v4139_v13 = vld [vmem:[%s4023_s21 + $0x2c] sm:$0xf] }
 0x14c   : > { %v4142_v14 = vld [vmem:[%s4023_s21 + $0x30] sm:$0xf]  ;;  %v4145_v15 = vld [vmem:[%s4023_s21 + $0x34] sm:$0xf]  ;;  %v4148_v16 = vld [vmem:[%s4023_s21 + $0x38] sm:$0xf] }
 0x14d   : > { %v4151_v17 = vld [vmem:[%s4023_s21 + $0x3c] sm:$0xf]  ;;  %s4154_s10 = sshll.u32 %s3803_s11, 7  ;;  %p2673_p13 = scmp.ne.s32.totalorder %s3811_s13, 0 }
 0x14e   : > { %s904_s16 = sshra.s32 (!%p2673_p13), %s4154_s10, 3 }
 0x14f   : > { %887 = sbr.rel (%p2673_p13) target bundleno = 584 (0x248), region = 68  ;;  %s2674_s8 = sshll.u32 (!%p2673_p13), %s904_s16, 2 }
 0x150   : > { %s4164_s21 = scalar_lea.vmem (!%p2673_p13), [#allocation2], %s2674_s8 }
 0x154   : > { %v2675_v18 = vcombine.low %v4106_v2, %v4109_v3  ;;  %v2679_v19 = vcombine.low %v4130_v10, %v4133_v11  ;;  %v3559_v20 = vld [vmem:[%s4164_s21 + $0x38] sm:$0xff]   ;;  %v3560_v21 = vld [vmem:[%s4164_s21 + $0x30] sm:$0xff]   ;;  %v3561_v22 = vld [vmem:[%s4164_s21 + $0x28] sm:$0xff]   ;;  %v2676_v28 = vcombine.low %v4112_v4, %v4115_v5  ;;  %v2680_v29 = vcombine.low %v4136_v12, %v4139_v13 }
 0x155   : > { %3176 = vmatprep.subr.bf16.mxu0 %v3559_v20  ;;  %3338 = vmatprep.subr.bf16.mxu1 %v3559_v20  ;;  %v3562_v23 = vld [vmem:[%s4164_s21 + $0x20] sm:$0xff]   ;;  %v3563_v24 = vld [vmem:[%s4164_s21 + $0x18] sm:$0xff]   ;;  %v3564_v25 = vld [vmem:[%s4164_s21 + $0x10] sm:$0xff]   ;;  %v2677_v30 = vcombine.low %v4118_v6, %v4121_v7  ;;  %v2681_v31 = vcombine.low %v4142_v14, %v4145_v15  ;;  %v2678_v32 = vcombine.low %v4124_v8, %v4127_v9 }
 0x156   : > { %3192 = vmatprep.mubr.bf16.mxu0 %v2675_v18  ;;  %3200 = vmatprep.mubr.bf16.mxu1 %v2679_v19  ;;  %v3565_v26 = vld [vmem:[%s4164_s21 + $0x8] sm:$0xff]   ;;  %v3566_v27 = vld [vmem:[%s4164_s21] sm:$0xff]   ;;  %v2682_v33 = vcombine.low %v4148_v16, %v4151_v17  ;;  %v890_v34 = vld [vmem:[#allocation5 + $0x58] sm:$0xff] }
 0x157   : > { %3177 = vmatpush3.bf16.msra.mxu0 %v3559_v20  ;;  %3346 = vmatpush3.bf16.msra.mxu1 %v3559_v20  ;;  %v898_v35 = vld [vmem:[#allocation5 + $0x10] sm:$0xff]  ;;  %v896_v39 = vld [vmem:[#allocation5 + $0x40] sm:$0xff]  ;;  %v891_v44 = vld [vmem:[#allocation5 + $0x18] sm:$0xff] }
 0x158   : > { %3178 = vmatprep.subr.bf16.mxu0 %v3560_v21  ;;  %3339 = vmatprep.subr.bf16.mxu1 %v3560_v21  ;;  %v888_v38 = vld [vmem:[#allocation5 + $0x30] sm:$0xff]  ;;  %v899_v45 = vld [vmem:[#allocation5 + $0x38] sm:$0xff]  ;;  %v889_v50 = vld [vmem:[#allocation5] sm:$0xff] }
 0x159   : > { %v897_v51 = vld [vmem:[#allocation5 + $0x20] sm:$0xff]  ;;  %v894_v56 = vld [vmem:[#allocation5 + $0x8] sm:$0xff]  ;;  %v902_v57 = vld [vmem:[#allocation5 + $0x78] sm:$0xff] }
 0x15a   : > { %v892_v62 = vld [vmem:[#allocation5 + $0x50] sm:$0xff]  ;;  %v900_v63 = vld [vmem:[#allocation5 + $0x60] sm:$0xff]  ;;  %v895_v20 = vld [vmem:[#allocation5 + $0x48] sm:$0xff] }
 0x15b   : > { %3179 = vmatpush3.bf16.msra.mxu0 %v3560_v21  ;;  %3347 = vmatpush3.bf16.msra.mxu1 %v3560_v21  ;;  %v903_v21 = vld [vmem:[#allocation5 + $0x28] sm:$0xff] }
 0x15c   : > { %3180 = vmatprep.subr.bf16.mxu0 %v3561_v22  ;;  %3340 = vmatprep.subr.bf16.mxu1 %v3561_v22 }
 0x15f   : > { %3181 = vmatpush3.bf16.msra.mxu0 %v3561_v22  ;;  %3348 = vmatpush3.bf16.msra.mxu1 %v3561_v22 }
 0x160   : > { %3182 = vmatprep.subr.bf16.mxu0 %v3562_v23  ;;  %3341 = vmatprep.subr.bf16.mxu1 %v3562_v23 }
 0x163   : > { %3183 = vmatpush3.bf16.msra.mxu0 %v3562_v23  ;;  %3349 = vmatpush3.bf16.msra.mxu1 %v3562_v23 }
 0x164   : > { %3184 = vmatprep.subr.bf16.mxu0 %v3563_v24  ;;  %3342 = vmatprep.subr.bf16.mxu1 %v3563_v24 }
 0x167   : > { %3185 = vmatpush3.bf16.msra.mxu0 %v3563_v24  ;;  %3350 = vmatpush3.bf16.msra.mxu1 %v3563_v24 }
 0x168   : > { %3186 = vmatprep.subr.bf16.mxu0 %v3564_v25  ;;  %3343 = vmatprep.subr.bf16.mxu1 %v3564_v25 }
 0x16b   : > { %3187 = vmatpush3.bf16.msra.mxu0 %v3564_v25  ;;  %3351 = vmatpush3.bf16.msra.mxu1 %v3564_v25 }
 0x16c   : > { %3188 = vmatprep.subr.bf16.mxu0 %v3565_v26  ;;  %3344 = vmatprep.subr.bf16.mxu1 %v3565_v26 }
 0x16f   : > { %3189 = vmatpush3.bf16.msra.mxu0 %v3565_v26  ;;  %3352 = vmatpush3.bf16.msra.mxu1 %v3565_v26  ;;  %v893_v26 = vld [vmem:[#allocation5 + $0x68] sm:$0xff] }
 0x170   : > { %3190 = vmatprep.subr.bf16.mxu0 %v3566_v27  ;;  %3345 = vmatprep.subr.bf16.mxu1 %v3566_v27 }
 0x173   : > { %3191 = vmatpush3.bf16.msra.mxu0 %v3566_v27  ;;  %3353 = vmatpush3.bf16.msra.mxu1 %v3566_v27  ;;  %v901_v27 = vld [vmem:[#allocation5 + $0x70] sm:$0xff] }
 0x176   : > { %3193 = vmatmul.mubr.bf16.vlgmr.msra.gmra.mxu0 %v2676_v28  ;;  %3201 = vmatmul.mubr.bf16.vlgmr.msra.gmra.mxu1 %v2680_v29 }
 0x177   : > { %3196 = vmatprep.mubr.bf16.mxu0 %v2677_v30  ;;  %3204 = vmatprep.mubr.bf16.mxu1 %v2681_v31 }
 0x17e   : > { %3197 = vmatmul.mubr.bf16.gmra.mxu0 %v2678_v32  ;;  %3205 = vmatmul.mubr.bf16.gmra.mxu1 %v2682_v33 }
 0x236   : > { %v3194_v36 = vpop.f32.mrf.mxu0  ;;  %v3202_v37 = vpop.f32.mrf.mxu1 }
 0x237   : > { %v1119_v40 = vadd.f32 %v3194_v36, %v890_v34  ;;  %v1127_v41 = vadd.f32 %v3202_v37, %v898_v35 }
 0x238   : > { %v1054_v42 = vpop.f32.mrf.mxu0  ;;  %v1086_v43 = vpop.f32.mrf.mxu1 }
 0x239   : > { %1135 = vst [vmem:[#allocation5 + $0x58] sm:$0xff] %v1119_v40  ;;  %1143 = vst [vmem:[#allocation5 + $0x10] sm:$0xff] %v1127_v41  ;;  %v1117_v46 = vadd.f32 %v1054_v42, %v888_v38  ;;  %v1125_v47 = vadd.f32 %v1086_v43, %v896_v39 }
 0x23a   : > { %v3195_v48 = vpop.f32.mrf.mxu0  ;;  %v3203_v49 = vpop.f32.mrf.mxu1 }
 0x23b   : > { %1133 = vst [vmem:[#allocation5 + $0x30] sm:$0xff] %v1117_v46  ;;  %1141 = vst [vmem:[#allocation5 + $0x40] sm:$0xff] %v1125_v47  ;;  %v1120_v52 = vadd.f32 %v3195_v48, %v891_v44  ;;  %v1128_v53 = vadd.f32 %v3203_v49, %v899_v45 }
 0x23c   : > { %v1057_v54 = vpop.f32.mrf.mxu0  ;;  %v1089_v55 = vpop.f32.mrf.mxu1 }
 0x23d   : > { %1136 = vst [vmem:[#allocation5 + $0x18] sm:$0xff] %v1120_v52  ;;  %1144 = vst [vmem:[#allocation5 + $0x38] sm:$0xff] %v1128_v53  ;;  %v1118_v58 = vadd.f32 %v1057_v54, %v889_v50  ;;  %v1126_v59 = vadd.f32 %v1089_v55, %v897_v51 }
 0x23e   : > { %v3198_v60 = vpop.f32.mrf.mxu0  ;;  %v3206_v61 = vpop.f32.mrf.mxu1 }
 0x23f   : > { %1134 = vst [vmem:[#allocation5] sm:$0xff] %v1118_v58  ;;  %1142 = vst [vmem:[#allocation5 + $0x20] sm:$0xff] %v1126_v59  ;;  %v1123_v0 = vadd.f32 %v3198_v60, %v894_v56  ;;  %v1131_v1 = vadd.f32 %v3206_v61, %v902_v57 }
 0x240   : > { %v1070_v18 = vpop.f32.mrf.mxu0  ;;  %v1102_v19 = vpop.f32.mrf.mxu1 }
 0x241   : > { %1139 = vst [vmem:[#allocation5 + $0x8] sm:$0xff] %v1123_v0  ;;  %1147 = vst [vmem:[#allocation5 + $0x78] sm:$0xff] %v1131_v1  ;;  %v1121_v22 = vadd.f32 %v1070_v18, %v892_v62  ;;  %v1129_v23 = vadd.f32 %v1102_v19, %v900_v63 }
 0x242   : > { %v3199_v24 = vpop.f32.mrf.mxu0  ;;  %v3207_v25 = vpop.f32.mrf.mxu1 }
 0x243   : > { %1137 = vst [vmem:[#allocation5 + $0x50] sm:$0xff] %v1121_v22  ;;  %1145 = vst [vmem:[#allocation5 + $0x60] sm:$0xff] %v1129_v23  ;;  %v1124_v28 = vadd.f32 %v3199_v24, %v895_v20  ;;  %v1132_v29 = vadd.f32 %v3207_v25, %v903_v21 }
 0x244   : > { %v1073_v30 = vpop.f32.mrf.mxu0  ;;  %v1105_v31 = vpop.f32.mrf.mxu1 }
 0x245   : > { %1140 = vst [vmem:[#allocation5 + $0x48] sm:$0xff] %v1124_v28  ;;  %1148 = vst [vmem:[#allocation5 + $0x28] sm:$0xff] %v1132_v29  ;;  %v1122_v32 = vadd.f32 %v1073_v30, %v893_v26  ;;  %v1130_v33 = vadd.f32 %v1105_v31, %v901_v27 }
 0x247   : > { %1138 = vst [vmem:[#allocation5 + $0x68] sm:$0xff] %v1122_v32  ;;  %1146 = vst [vmem:[#allocation5 + $0x70] sm:$0xff] %v1130_v33 }
 0x248 PF: > { %p2691_p0 = scmp.ne.s32.totalorder %s3811_s13, 1 }
 0x249   : > { %s1169_s19 = sshra.s32 (!%p2691_p0), %s4154_s10, 3 }
 0x24a   : > { %1152 = sbr.rel (%p2691_p0) target bundleno = 835 (0x343), region = 72  ;;  %s2692_s18 = sshll.u32 (!%p2691_p0), %s1169_s19, 2 }
 0x24b   : > { %s4194_s22 = scalar_lea.vmem (!%p2691_p0), [#allocation3], %s2692_s18 }
 0x24f   : > { %v2693_v34 = vcombine.low %v4106_v2, %v4109_v3  ;;  %v2697_v35 = vcombine.low %v4130_v10, %v4133_v11  ;;  %v3567_v36 = vld [vmem:[%s4194_s22 + $0x38] sm:$0xff]   ;;  %v3568_v37 = vld [vmem:[%s4194_s22 + $0x30] sm:$0xff]   ;;  %v3569_v38 = vld [vmem:[%s4194_s22 + $0x28] sm:$0xff]   ;;  %v2694_v44 = vcombine.low %v4112_v4, %v4115_v5  ;;  %v2698_v45 = vcombine.low %v4136_v12, %v4139_v13 }
 0x250   : > { %3208 = vmatprep.subr.bf16.mxu0 %v3567_v36  ;;  %3354 = vmatprep.subr.bf16.mxu1 %v3567_v36  ;;  %v3570_v39 = vld [vmem:[%s4194_s22 + $0x20] sm:$0xff]   ;;  %v3571_v40 = vld [vmem:[%s4194_s22 + $0x18] sm:$0xff]   ;;  %v3572_v41 = vld [vmem:[%s4194_s22 + $0x10] sm:$0xff]   ;;  %v2695_v46 = vcombine.low %v4118_v6, %v4121_v7  ;;  %v2699_v47 = vcombine.low %v4142_v14, %v4145_v15  ;;  %v2696_v48 = vcombine.low %v4124_v8, %v4127_v9 }
 0x251   : > { %3224 = vmatprep.mubr.bf16.mxu0 %v2693_v34  ;;  %3232 = vmatprep.mubr.bf16.mxu1 %v2697_v35  ;;  %v3573_v42 = vld [vmem:[%s4194_s22 + $0x8] sm:$0xff]   ;;  %v3574_v43 = vld [vmem:[%s4194_s22] sm:$0xff]   ;;  %v2700_v49 = vcombine.low %v4148_v16, %v4151_v17  ;;  %v1155_v50 = vld [vmem:[#allocation5 + $0x58] sm:$0xff] }
 0x252   : > { %3209 = vmatpush3.bf16.msra.mxu0 %v3567_v36  ;;  %3362 = vmatpush3.bf16.msra.mxu1 %v3567_v36  ;;  %v1163_v51 = vld [vmem:[#allocation5 + $0x10] sm:$0xff]  ;;  %v1161_v55 = vld [vmem:[#allocation5 + $0x40] sm:$0xff]  ;;  %v1156_v60 = vld [vmem:[#allocation5 + $0x18] sm:$0xff] }
 0x253   : > { %3210 = vmatprep.subr.bf16.mxu0 %v3568_v37  ;;  %3355 = vmatprep.subr.bf16.mxu1 %v3568_v37  ;;  %v1153_v54 = vld [vmem:[#allocation5 + $0x30] sm:$0xff]  ;;  %v1164_v61 = vld [vmem:[#allocation5 + $0x38] sm:$0xff]  ;;  %v1154_v18 = vld [vmem:[#allocation5] sm:$0xff] }
 0x254   : > { %v1162_v19 = vld [vmem:[#allocation5 + $0x20] sm:$0xff]  ;;  %v1159_v24 = vld [vmem:[#allocation5 + $0x8] sm:$0xff]  ;;  %v1167_v25 = vld [vmem:[#allocation5 + $0x78] sm:$0xff] }
 0x255   : > { %v1157_v30 = vld [vmem:[#allocation5 + $0x50] sm:$0xff]  ;;  %v1165_v31 = vld [vmem:[#allocation5 + $0x60] sm:$0xff]  ;;  %v1160_v36 = vld [vmem:[#allocation5 + $0x48] sm:$0xff] }
 0x256   : > { %3211 = vmatpush3.bf16.msra.mxu0 %v3568_v37  ;;  %3363 = vmatpush3.bf16.msra.mxu1 %v3568_v37  ;;  %v1168_v37 = vld [vmem:[#allocation5 + $0x28] sm:$0xff] }
 0x257   : > { %3212 = vmatprep.subr.bf16.mxu0 %v3569_v38  ;;  %3356 = vmatprep.subr.bf16.mxu1 %v3569_v38 }
 0x25a   : > { %3213 = vmatpush3.bf16.msra.mxu0 %v3569_v38  ;;  %3364 = vmatpush3.bf16.msra.mxu1 %v3569_v38 }
 0x25b   : > { %3214 = vmatprep.subr.bf16.mxu0 %v3570_v39  ;;  %3357 = vmatprep.subr.bf16.mxu1 %v3570_v39 }
 0x25e   : > { %3215 = vmatpush3.bf16.msra.mxu0 %v3570_v39  ;;  %3365 = vmatpush3.bf16.msra.mxu1 %v3570_v39 }
 0x25f   : > { %3216 = vmatprep.subr.bf16.mxu0 %v3571_v40  ;;  %3358 = vmatprep.subr.bf16.mxu1 %v3571_v40 }
 0x262   : > { %3217 = vmatpush3.bf16.msra.mxu0 %v3571_v40  ;;  %3366 = vmatpush3.bf16.msra.mxu1 %v3571_v40 }
 0x263   : > { %3218 = vmatprep.subr.bf16.mxu0 %v3572_v41  ;;  %3359 = vmatprep.subr.bf16.mxu1 %v3572_v41 }
 0x266   : > { %3219 = vmatpush3.bf16.msra.mxu0 %v3572_v41  ;;  %3367 = vmatpush3.bf16.msra.mxu1 %v3572_v41 }
 0x267   : > { %3220 = vmatprep.subr.bf16.mxu0 %v3573_v42  ;;  %3360 = vmatprep.subr.bf16.mxu1 %v3573_v42 }
 0x26a   : > { %3221 = vmatpush3.bf16.msra.mxu0 %v3573_v42  ;;  %3368 = vmatpush3.bf16.msra.mxu1 %v3573_v42  ;;  %v1158_v42 = vld [vmem:[#allocation5 + $0x68] sm:$0xff] }
 0x26b   : > { %3222 = vmatprep.subr.bf16.mxu0 %v3574_v43  ;;  %3361 = vmatprep.subr.bf16.mxu1 %v3574_v43 }
 0x26e   : > { %3223 = vmatpush3.bf16.msra.mxu0 %v3574_v43  ;;  %3369 = vmatpush3.bf16.msra.mxu1 %v3574_v43  ;;  %v1166_v43 = vld [vmem:[#allocation5 + $0x70] sm:$0xff] }
 0x271   : > { %3225 = vmatmul.mubr.bf16.vlgmr.msra.gmra.mxu0 %v2694_v44  ;;  %3233 = vmatmul.mubr.bf16.vlgmr.msra.gmra.mxu1 %v2698_v45 }
 0x272   : > { %3228 = vmatprep.mubr.bf16.mxu0 %v2695_v46  ;;  %3236 = vmatprep.mubr.bf16.mxu1 %v2699_v47 }
 0x279   : > { %3229 = vmatmul.mubr.bf16.gmra.mxu0 %v2696_v48  ;;  %3237 = vmatmul.mubr.bf16.gmra.mxu1 %v2700_v49 }
 0x331   : > { %v3226_v52 = vpop.f32.mrf.mxu0  ;;  %v3234_v53 = vpop.f32.mrf.mxu1 }
 0x332   : > { %v1384_v56 = vadd.f32 %v3226_v52, %v1155_v50  ;;  %v1392_v57 = vadd.f32 %v3234_v53, %v1163_v51 }
 0x333   : > { %v1319_v58 = vpop.f32.mrf.mxu0  ;;  %v1351_v59 = vpop.f32.mrf.mxu1 }
 0x334   : > { %1400 = vst [vmem:[#allocation5 + $0x58] sm:$0xff] %v1384_v56  ;;  %1408 = vst [vmem:[#allocation5 + $0x10] sm:$0xff] %v1392_v57  ;;  %v1382_v62 = vadd.f32 %v1319_v58, %v1153_v54  ;;  %v1390_v63 = vadd.f32 %v1351_v59, %v1161_v55 }
 0x335   : > { %v3227_v0 = vpop.f32.mrf.mxu0  ;;  %v3235_v1 = vpop.f32.mrf.mxu1 }
 0x336   : > { %1398 = vst [vmem:[#allocation5 + $0x30] sm:$0xff] %v1382_v62  ;;  %1406 = vst [vmem:[#allocation5 + $0x40] sm:$0xff] %v1390_v63  ;;  %v1385_v20 = vadd.f32 %v3227_v0, %v1156_v60  ;;  %v1393_v21 = vadd.f32 %v3235_v1, %v1164_v61 }
 0x337   : > { %v1322_v22 = vpop.f32.mrf.mxu0  ;;  %v1354_v23 = vpop.f32.mrf.mxu1 }
 0x338   : > { %1401 = vst [vmem:[#allocation5 + $0x18] sm:$0xff] %v1385_v20  ;;  %1409 = vst [vmem:[#allocation5 + $0x38] sm:$0xff] %v1393_v21  ;;  %v1383_v26 = vadd.f32 %v1322_v22, %v1154_v18  ;;  %v1391_v27 = vadd.f32 %v1354_v23, %v1162_v19 }
 0x339   : > { %v3230_v28 = vpop.f32.mrf.mxu0  ;;  %v3238_v29 = vpop.f32.mrf.mxu1 }
 0x33a   : > { %1399 = vst [vmem:[#allocation5] sm:$0xff] %v1383_v26  ;;  %1407 = vst [vmem:[#allocation5 + $0x20] sm:$0xff] %v1391_v27  ;;  %v1388_v32 = vadd.f32 %v3230_v28, %v1159_v24  ;;  %v1396_v33 = vadd.f32 %v3238_v29, %v1167_v25 }
 0x33b   : > { %v1335_v34 = vpop.f32.mrf.mxu0  ;;  %v1367_v35 = vpop.f32.mrf.mxu1 }
 0x33c   : > { %1404 = vst [vmem:[#allocation5 + $0x8] sm:$0xff] %v1388_v32  ;;  %1412 = vst [vmem:[#allocation5 + $0x78] sm:$0xff] %v1396_v33  ;;  %v1386_v38 = vadd.f32 %v1335_v34, %v1157_v30  ;;  %v1394_v39 = vadd.f32 %v1367_v35, %v1165_v31 }
 0x33d   : > { %v3231_v40 = vpop.f32.mrf.mxu0  ;;  %v3239_v41 = vpop.f32.mrf.mxu1 }
 0x33e   : > { %1402 = vst [vmem:[#allocation5 + $0x50] sm:$0xff] %v1386_v38  ;;  %1410 = vst [vmem:[#allocation5 + $0x60] sm:$0xff] %v1394_v39  ;;  %v1389_v44 = vadd.f32 %v3231_v40, %v1160_v36  ;;  %v1397_v45 = vadd.f32 %v3239_v41, %v1168_v37 }
 0x33f   : > { %v1338_v46 = vpop.f32.mrf.mxu0  ;;  %v1370_v47 = vpop.f32.mrf.mxu1 }
 0x340   : > { %1405 = vst [vmem:[#allocation5 + $0x48] sm:$0xff] %v1389_v44  ;;  %1413 = vst [vmem:[#allocation5 + $0x28] sm:$0xff] %v1397_v45  ;;  %v1387_v48 = vadd.f32 %v1338_v46, %v1158_v42  ;;  %v1395_v49 = vadd.f32 %v1370_v47, %v1166_v43 }
 0x342   : > { %1403 = vst [vmem:[#allocation5 + $0x68] sm:$0xff] %v1387_v48  ;;  %1411 = vst [vmem:[#allocation5 + $0x70] sm:$0xff] %v1395_v49 }
 0x343 PF: > { %p2709_p5 = scmp.ne.s32.totalorder %s3811_s13, 2 }
 0x344   : > { %s1434_s30 = sshra.s32 (!%p2709_p5), %s4154_s10, 3 }
 0x345   : > { %1417 = sbr.rel (%p2709_p5) target bundleno = 1086 (0x43e), region = 76  ;;  %s2710_s27 = sshll.u32 (!%p2709_p5), %s1434_s30, 2 }
 0x346   : > { %s4224_s29 = scalar_lea.vmem (!%p2709_p5), [#allocation4], %s2710_s27 }
 0x34a   : > { %v2711_v50 = vcombine.low %v4106_v2, %v4109_v3  ;;  %v2715_v51 = vcombine.low %v4130_v10, %v4133_v11  ;;  %v3575_v52 = vld [vmem:[%s4224_s29 + $0x38] sm:$0xff]   ;;  %v3576_v53 = vld [vmem:[%s4224_s29 + $0x30] sm:$0xff]   ;;  %v3577_v2 = vld [vmem:[%s4224_s29 + $0x28] sm:$0xff]   ;;  %v2712_v56 = vcombine.low %v4112_v4, %v4115_v5  ;;  %v2716_v57 = vcombine.low %v4136_v12, %v4139_v13 }
 0x34b   : > { %3240 = vmatprep.subr.bf16.mxu0 %v3575_v52  ;;  %3370 = vmatprep.subr.bf16.mxu1 %v3575_v52  ;;  %v3578_v3 = vld [vmem:[%s4224_s29 + $0x20] sm:$0xff]   ;;  %v3579_v10 = vld [vmem:[%s4224_s29 + $0x18] sm:$0xff]   ;;  %v3580_v11 = vld [vmem:[%s4224_s29 + $0x10] sm:$0xff]   ;;  %v2713_v58 = vcombine.low %v4118_v6, %v4121_v7  ;;  %v2717_v59 = vcombine.low %v4142_v14, %v4145_v15  ;;  %v2714_v60 = vcombine.low %v4124_v8, %v4127_v9 }
 0x34c   : > { %3256 = vmatprep.mubr.bf16.mxu0 %v2711_v50  ;;  %3264 = vmatprep.mubr.bf16.mxu1 %v2715_v51  ;;  %v3581_v54 = vld [vmem:[%s4224_s29 + $0x8] sm:$0xff]   ;;  %v3582_v55 = vld [vmem:[%s4224_s29] sm:$0xff]   ;;  %v2718_v4 = vcombine.low %v4148_v16, %v4151_v17  ;;  %v1420_v5 = vld [vmem:[#allocation5 + $0x58] sm:$0xff] }
 0x34d   : > { %3241 = vmatpush3.bf16.msra.mxu0 %v3575_v52  ;;  %3378 = vmatpush3.bf16.msra.mxu1 %v3575_v52  ;;  %v1428_v12 = vld [vmem:[#allocation5 + $0x10] sm:$0xff]  ;;  %v1426_v7 = vld [vmem:[#allocation5 + $0x40] sm:$0xff]  ;;  %v1421_v0 = vld [vmem:[#allocation5 + $0x18] sm:$0xff] }
 0x34e   : > { %3242 = vmatprep.subr.bf16.mxu0 %v3576_v53  ;;  %3371 = vmatprep.subr.bf16.mxu1 %v3576_v53  ;;  %v1418_v6 = vld [vmem:[#allocation5 + $0x30] sm:$0xff]  ;;  %v1429_v1 = vld [vmem:[#allocation5 + $0x38] sm:$0xff]  ;;  %v1419_v17 = vld [vmem:[#allocation5] sm:$0xff] }
 0x34f   : > { %v1427_v19 = vld [vmem:[#allocation5 + $0x20] sm:$0xff]  ;;  %v1424_v24 = vld [vmem:[#allocation5 + $0x8] sm:$0xff]  ;;  %v1432_v25 = vld [vmem:[#allocation5 + $0x78] sm:$0xff] }
 0x350   : > { %v1422_v30 = vld [vmem:[#allocation5 + $0x50] sm:$0xff]  ;;  %v1430_v31 = vld [vmem:[#allocation5 + $0x60] sm:$0xff]  ;;  %v1425_v36 = vld [vmem:[#allocation5 + $0x48] sm:$0xff] }
 0x351   : > { %3243 = vmatpush3.bf16.msra.mxu0 %v3576_v53  ;;  %3379 = vmatpush3.bf16.msra.mxu1 %v3576_v53  ;;  %v1433_v37 = vld [vmem:[#allocation5 + $0x28] sm:$0xff]  ;;  %v1431_v43 = vld [vmem:[#allocation5 + $0x70] sm:$0xff] }
 0x352   : > { %3244 = vmatprep.subr.bf16.mxu0 %v3577_v2  ;;  %3372 = vmatprep.subr.bf16.mxu1 %v3577_v2  ;;  %v1423_v42 = vld [vmem:[#allocation5 + $0x68] sm:$0xff] }
 0x355   : > { %3245 = vmatpush3.bf16.msra.mxu0 %v3577_v2  ;;  %3380 = vmatpush3.bf16.msra.mxu1 %v3577_v2 }
 0x356   : > { %3246 = vmatprep.subr.bf16.mxu0 %v3578_v3  ;;  %3373 = vmatprep.subr.bf16.mxu1 %v3578_v3 }
 0x359   : > { %3247 = vmatpush3.bf16.msra.mxu0 %v3578_v3  ;;  %3381 = vmatpush3.bf16.msra.mxu1 %v3578_v3 }
 0x35a   : > { %3248 = vmatprep.subr.bf16.mxu0 %v3579_v10  ;;  %3374 = vmatprep.subr.bf16.mxu1 %v3579_v10 }
 0x35d   : > { %3249 = vmatpush3.bf16.msra.mxu0 %v3579_v10  ;;  %3382 = vmatpush3.bf16.msra.mxu1 %v3579_v10 }
 0x35e   : > { %3250 = vmatprep.subr.bf16.mxu0 %v3580_v11  ;;  %3375 = vmatprep.subr.bf16.mxu1 %v3580_v11 }
 0x361   : > { %3251 = vmatpush3.bf16.msra.mxu0 %v3580_v11  ;;  %3383 = vmatpush3.bf16.msra.mxu1 %v3580_v11 }
 0x362   : > { %3252 = vmatprep.subr.bf16.mxu0 %v3581_v54  ;;  %3376 = vmatprep.subr.bf16.mxu1 %v3581_v54 }
 0x365   : > { %3253 = vmatpush3.bf16.msra.mxu0 %v3581_v54  ;;  %3384 = vmatpush3.bf16.msra.mxu1 %v3581_v54 }
 0x366   : > { %3254 = vmatprep.subr.bf16.mxu0 %v3582_v55  ;;  %3377 = vmatprep.subr.bf16.mxu1 %v3582_v55 }
 0x369   : > { %3255 = vmatpush3.bf16.msra.mxu0 %v3582_v55  ;;  %3385 = vmatpush3.bf16.msra.mxu1 %v3582_v55 }
 0x36c   : > { %3257 = vmatmul.mubr.bf16.vlgmr.msra.gmra.mxu0 %v2712_v56  ;;  %3265 = vmatmul.mubr.bf16.vlgmr.msra.gmra.mxu1 %v2716_v57 }
 0x36d   : > { %3260 = vmatprep.mubr.bf16.mxu0 %v2713_v58  ;;  %3268 = vmatprep.mubr.bf16.mxu1 %v2717_v59 }
 0x374   : > { %3261 = vmatmul.mubr.bf16.gmra.mxu0 %v2714_v60  ;;  %3269 = vmatmul.mubr.bf16.gmra.mxu1 %v2718_v4 }
 0x42c   : > { %v3258_v13 = vpop.f32.mrf.mxu0  ;;  %v3266_v61 = vpop.f32.mrf.mxu1 }
 0x42d   : > { %v1649_v62 = vadd.f32 %v3258_v13, %v1420_v5  ;;  %v1657_v14 = vadd.f32 %v3266_v61, %v1428_v12 }
 0x42e   : > { %v1584_v15 = vpop.f32.mrf.mxu0  ;;  %v1616_v63 = vpop.f32.mrf.mxu1 }
 0x42f   : > { %1665 = vst [vmem:[#allocation5 + $0x58] sm:$0xff] %v1649_v62  ;;  %1673 = vst [vmem:[#allocation5 + $0x10] sm:$0xff] %v1657_v14  ;;  %v1647_v8 = vadd.f32 %v1584_v15, %v1418_v6  ;;  %v1655_v9 = vadd.f32 %v1616_v63, %v1426_v7 }
 0x430   : > { %v3259_v18 = vpop.f32.mrf.mxu0  ;;  %v3267_v16 = vpop.f32.mrf.mxu1 }
 0x431   : > { %1663 = vst [vmem:[#allocation5 + $0x30] sm:$0xff] %v1647_v8  ;;  %1671 = vst [vmem:[#allocation5 + $0x40] sm:$0xff] %v1655_v9  ;;  %v1650_v20 = vadd.f32 %v3259_v18, %v1421_v0  ;;  %v1658_v21 = vadd.f32 %v3267_v16, %v1429_v1 }
 0x432   : > { %v1587_v22 = vpop.f32.mrf.mxu0  ;;  %v1619_v23 = vpop.f32.mrf.mxu1 }
 0x433   : > { %1666 = vst [vmem:[#allocation5 + $0x18] sm:$0xff] %v1650_v20  ;;  %1674 = vst [vmem:[#allocation5 + $0x38] sm:$0xff] %v1658_v21  ;;  %v1648_v26 = vadd.f32 %v1587_v22, %v1419_v17  ;;  %v1656_v27 = vadd.f32 %v1619_v23, %v1427_v19 }
 0x434   : > { %v3262_v28 = vpop.f32.mrf.mxu0  ;;  %v3270_v29 = vpop.f32.mrf.mxu1 }
 0x435   : > { %1664 = vst [vmem:[#allocation5] sm:$0xff] %v1648_v26  ;;  %1672 = vst [vmem:[#allocation5 + $0x20] sm:$0xff] %v1656_v27  ;;  %v1653_v32 = vadd.f32 %v3262_v28, %v1424_v24  ;;  %v1661_v33 = vadd.f32 %v3270_v29, %v1432_v25 }
 0x436   : > { %v1600_v34 = vpop.f32.mrf.mxu0  ;;  %v1632_v35 = vpop.f32.mrf.mxu1 }
 0x437   : > { %1669 = vst [vmem:[#allocation5 + $0x8] sm:$0xff] %v1653_v32  ;;  %1677 = vst [vmem:[#allocation5 + $0x78] sm:$0xff] %v1661_v33  ;;  %v1651_v38 = vadd.f32 %v1600_v34, %v1422_v30  ;;  %v1659_v39 = vadd.f32 %v1632_v35, %v1430_v31 }
 0x438   : > { %v3263_v40 = vpop.f32.mrf.mxu0  ;;  %v3271_v41 = vpop.f32.mrf.mxu1 }
 0x439   : > { %1667 = vst [vmem:[#allocation5 + $0x50] sm:$0xff] %v1651_v38  ;;  %1675 = vst [vmem:[#allocation5 + $0x60] sm:$0xff] %v1659_v39  ;;  %v1654_v44 = vadd.f32 %v3263_v40, %v1425_v36  ;;  %v1662_v45 = vadd.f32 %v3271_v41, %v1433_v37 }
 0x43a   : > { %v1603_v46 = vpop.f32.mrf.mxu0  ;;  %v1635_v47 = vpop.f32.mrf.mxu1 }
 0x43b   : > { %1670 = vst [vmem:[#allocation5 + $0x48] sm:$0xff] %v1654_v44  ;;  %1678 = vst [vmem:[#allocation5 + $0x28] sm:$0xff] %v1662_v45  ;;  %v1652_v48 = vadd.f32 %v1603_v46, %v1423_v42  ;;  %v1660_v49 = vadd.f32 %v1635_v47, %v1431_v43 }
 0x43d   : > { %1668 = vst [vmem:[#allocation5 + $0x68] sm:$0xff] %v1652_v48  ;;  %1676 = vst [vmem:[#allocation5 + $0x70] sm:$0xff] %v1660_v49 }
 0x43e PF: > { %p2727_p2 = scmp.ne.s32.totalorder %s3803_s11, 1 }
 0x43f   : > { %s2728_s25 = sshll.u32 (!%p2727_p2), %s3807_s12, 7 }
 0x440   : > { %1682 = sbr.rel (%p2727_p2) target bundleno = 1944 (0x798), region = 80 }
 0x445   : > { %v4248_v50 = vld [vmem:[#allocation5 + $0x30] sm:$0xff]  ;;  %v4250_v51 = vld [vmem:[#allocation5] sm:$0xff]  ;;  %v4252_v52 = vld [vmem:[#allocation5 + $0x58] sm:$0xff]  ;;  %s1806_s20 = sshra.s32 (!%p2673_p13), %s2728_s25, 3 }
 0x446   : > { %v4254_v53 = vld [vmem:[#allocation5 + $0x18] sm:$0xff]  ;;  %v4256_v2 = vld [vmem:[#allocation5 + $0x50] sm:$0xff]  ;;  %v4258_v3 = vld [vmem:[#allocation5 + $0x68] sm:$0xff]  ;;  %1702 = sbr.rel (%p2673_p13) target bundleno = 1114 (0x45a), region = 84  ;;  %s2747_s10 = sshll.u32 (!%p2673_p13), %s1806_s20, 2 }
 0x447   : > { %v4260_v10 = vld [vmem:[#allocation5 + $0x8] sm:$0xff]  ;;  %v4264_v54 = vld [vmem:[#allocation5 + $0x40] sm:$0xff]  ;;  %v4268_v56 = vld [vmem:[#allocation5 + $0x10] sm:$0xff]  ;;  %s1809_s16 = scalar_lea.vmem (!%p2673_p13), [#allocation3], %s2747_s10 }
 0x448   : > { %v4262_v11 = vld [vmem:[#allocation5 + $0x48] sm:$0xff]  ;;  %v4266_v55 = vld [vmem:[#allocation5 + $0x20] sm:$0xff]  ;;  %v4270_v57 = vld [vmem:[#allocation5 + $0x38] sm:$0xff] }
 0x449   : > { %v4272_v58 = vld [vmem:[#allocation5 + $0x60] sm:$0xff]  ;;  %v4274_v59 = vld [vmem:[#allocation5 + $0x70] sm:$0xff]  ;;  %v4276_v60 = vld [vmem:[#allocation5 + $0x78] sm:$0xff] }
 0x44a   : > { %v4278_v4 = vld [vmem:[#allocation5 + $0x28] sm:$0xff] }
 0x44b   : > { %v2730_v5 = vld [vmem:[%s4636_s3] ss:$0 sm:$0xff] }
 0x44c   : > { %v1710_v12 = vadd.f32 %v2730_v5, %v4248_v50  ;;  %v1711_v13 = vadd.f32 %v2730_v5, %v4250_v51  ;;  %v1712_v61 = vadd.f32 %v2730_v5, %v4252_v52  ;;  %v1713_v6 = vadd.f32 %v2730_v5, %v4254_v53 }
 0x44d   : > { %v1714_v7 = vadd.f32 %v2730_v5, %v4256_v2  ;;  %v1715_v62 = vadd.f32 %v2730_v5, %v4258_v3  ;;  %v1716_v14 = vadd.f32 %v2730_v5, %v4260_v10  ;;  %v1717_v15 = vadd.f32 %v2730_v5, %v4262_v11 }
 0x44e   : > { %v1726_v63 = vmax.f32 %v1710_v12, 0.0  ;;  %v1727_v0 = vmax.f32 %v1711_v13, 0.0  ;;  %v1728_v1 = vmax.f32 %v1712_v61, 0.0  ;;  %v1729_v8 = vmax.f32 %v1713_v6, 0.0 }
 0x44f   : > { %v1730_v9 = vmax.f32 %v1714_v7, 0.0  ;;  %v1731_v18 = vmax.f32 %v1715_v62, 0.0  ;;  %v1732_v16 = vmax.f32 %v1716_v14, 0.0  ;;  %v1733_v17 = vmax.f32 %v1717_v15, 0.0 }
 0x450   : > { %v2939_v19 = vpack.c.bf16 %v1727_v0, %v1726_v63  ;;  %v2944_v20 = vpack.c.bf16 %v1729_v8, %v1728_v1  ;;  %v1718_v21 = vadd.f32 %v2730_v5, %v4264_v54  ;;  %v1719_v22 = vadd.f32 %v2730_v5, %v4266_v55 }
 0x451   : > { %v2949_v23 = vpack.c.bf16 %v1731_v18, %v1730_v9  ;;  %v2954_v24 = vpack.c.bf16 %v1733_v17, %v1732_v16  ;;  %v1720_v25 = vadd.f32 %v2730_v5, %v4268_v56  ;;  %v1721_v26 = vadd.f32 %v2730_v5, %v4270_v57 }
 0x452   : > { %2940 = vst [vmem:[%s1809_s16] sm:$0xff] %v2939_v19   ;;  %3031 = vst [vmem:[%s1809_s16 + $0x8] sm:$0xff] %v2944_v20   ;;  %v1734_v27 = vmax.f32 %v1718_v21, 0.0  ;;  %v1735_v28 = vmax.f32 %v1719_v22, 0.0  ;;  %v1722_v29 = vadd.f32 %v2730_v5, %v4272_v58  ;;  %v1723_v30 = vadd.f32 %v2730_v5, %v4274_v59 }
 0x453   : > { %3032 = vst [vmem:[%s1809_s16 + $0x10] sm:$0xff] %v2949_v23   ;;  %3033 = vst [vmem:[%s1809_s16 + $0x18] sm:$0xff] %v2954_v24   ;;  %v1736_v31 = vmax.f32 %v1720_v25, 0.0  ;;  %v1737_v32 = vmax.f32 %v1721_v26, 0.0  ;;  %v1724_v33 = vadd.f32 %v2730_v5, %v4276_v60  ;;  %v1725_v34 = vadd.f32 %v2730_v5, %v4278_v4 }
 0x454   : > { %v2959_v35 = vpack.c.bf16 %v1735_v28, %v1734_v27  ;;  %v1738_v36 = vmax.f32 %v1722_v29, 0.0  ;;  %v1739_v37 = vmax.f32 %v1723_v30, 0.0 }
 0x455   : > { %v2964_v38 = vpack.c.bf16 %v1737_v32, %v1736_v31  ;;  %v1740_v39 = vmax.f32 %v1724_v33, 0.0  ;;  %v1741_v40 = vmax.f32 %v1725_v34, 0.0 }
 0x456   : > { %3034 = vst [vmem:[%s1809_s16 + $0x20] sm:$0xff] %v2959_v35   ;;  %v2969_v41 = vpack.c.bf16 %v1739_v37, %v1738_v36 }
 0x457   : > { %3035 = vst [vmem:[%s1809_s16 + $0x28] sm:$0xff] %v2964_v38   ;;  %v2974_v42 = vpack.c.bf16 %v1741_v40, %v1740_v39 }
 0x458   : > { %3036 = vst [vmem:[%s1809_s16 + $0x30] sm:$0xff] %v2969_v41  }
 0x459   : > { %3037 = vst [vmem:[%s1809_s16 + $0x38] sm:$0xff] %v2974_v42  }
 0x45a PF: > { %1828 = sbr.rel (%p2691_p0) target bundleno = 1364 (0x554), region = 88  ;;  %s2069_s18 = sshra.s32 (!%p2691_p0), %s2728_s25, 3 }
 0x45b   : > { %s2774_s27 = sshll.u32 (!%p2691_p0), %s2069_s18, 2 }
 0x45c   : > { %s2072_s25 = scalar_lea.vmem (!%p2691_p0), [#allocation4], %s2774_s27 }
 0x45f   : > { %v3583_v43 = vld [vmem:[%s4637_s4 + $0x38] sm:$0xff]   ;;  %v3584_v44 = vld [vmem:[%s4637_s4 + $0x30] sm:$0xff]   ;;  %v1829_v45 = vpack.c.bf16 %v4250_v51, %v4248_v50  ;;  %v1833_v46 = vpack.c.bf16 %v4266_v55, %v4264_v54  ;;  %v3585_v47 = vld [vmem:[%s4637_s4 + $0x28] sm:$0xff]   ;;  %v1830_v61 = vpack.c.bf16 %v4254_v53, %v4252_v52  ;;  %v1834_v6 = vpack.c.bf16 %v4270_v57, %v4268_v56 }
 0x460   : > { %3272 = vmatprep.subr.bf16.mxu0 %v3583_v43  ;;  %3386 = vmatprep.subr.bf16.mxu1 %v3583_v43  ;;  %v3586_v48 = vld [vmem:[%s4637_s4 + $0x20] sm:$0xff]   ;;  %v3587_v49 = vld [vmem:[%s4637_s4 + $0x18] sm:$0xff]   ;;  %v3588_v5 = vld [vmem:[%s4637_s4 + $0x10] sm:$0xff]   ;;  %v1831_v7 = vpack.c.bf16 %v4258_v3, %v4256_v2  ;;  %v1835_v62 = vpack.c.bf16 %v4274_v59, %v4272_v58  ;;  %v1832_v14 = vpack.c.bf16 %v4262_v11, %v4260_v10 }
 0x461   : > { %3273 = vmatpush3.bf16.msra.mxu0 %v3583_v43  ;;  %3394 = vmatpush3.bf16.msra.mxu1 %v3583_v43  ;;  %v3589_v12 = vld [vmem:[%s4637_s4 + $0x8] sm:$0xff]   ;;  %v3590_v13 = vld [vmem:[%s4637_s4] sm:$0xff]   ;;  %v1836_v15 = vpack.c.bf16 %v4278_v4, %v4276_v60 }
 0x462   : > { %3274 = vmatprep.subr.bf16.mxu0 %v3584_v44  ;;  %3387 = vmatprep.subr.bf16.mxu1 %v3584_v44  ;;  %v2749_v1 = vld [vmem:[%s4638_s5] ss:$0 sm:$0xff] }
 0x463   : > { %3288 = vmatprep.mubr.bf16.mxu0 %v1829_v45  ;;  %3296 = vmatprep.mubr.bf16.mxu1 %v1833_v46 }
 0x465   : > { %3275 = vmatpush3.bf16.msra.mxu0 %v3584_v44  ;;  %3395 = vmatpush3.bf16.msra.mxu1 %v3584_v44 }
 0x466   : > { %3276 = vmatprep.subr.bf16.mxu0 %v3585_v47  ;;  %3388 = vmatprep.subr.bf16.mxu1 %v3585_v47 }
 0x469   : > { %3277 = vmatpush3.bf16.msra.mxu0 %v3585_v47  ;;  %3396 = vmatpush3.bf16.msra.mxu1 %v3585_v47 }
 0x46a   : > { %3278 = vmatprep.subr.bf16.mxu0 %v3586_v48  ;;  %3389 = vmatprep.subr.bf16.mxu1 %v3586_v48 }
 0x46d   : > { %3279 = vmatpush3.bf16.msra.mxu0 %v3586_v48  ;;  %3397 = vmatpush3.bf16.msra.mxu1 %v3586_v48 }
 0x46e   : > { %3280 = vmatprep.subr.bf16.mxu0 %v3587_v49  ;;  %3390 = vmatprep.subr.bf16.mxu1 %v3587_v49 }
 0x471   : > { %3281 = vmatpush3.bf16.msra.mxu0 %v3587_v49  ;;  %3398 = vmatpush3.bf16.msra.mxu1 %v3587_v49 }
 0x472   : > { %3282 = vmatprep.subr.bf16.mxu0 %v3588_v5  ;;  %3391 = vmatprep.subr.bf16.mxu1 %v3588_v5 }
 0x475   : > { %3283 = vmatpush3.bf16.msra.mxu0 %v3588_v5  ;;  %3399 = vmatpush3.bf16.msra.mxu1 %v3588_v5 }
 0x476   : > { %3284 = vmatprep.subr.bf16.mxu0 %v3589_v12  ;;  %3392 = vmatprep.subr.bf16.mxu1 %v3589_v12 }
 0x479   : > { %3285 = vmatpush3.bf16.msra.mxu0 %v3589_v12  ;;  %3400 = vmatpush3.bf16.msra.mxu1 %v3589_v12 }
 0x47a   : > { %3286 = vmatprep.subr.bf16.mxu0 %v3590_v13  ;;  %3393 = vmatprep.subr.bf16.mxu1 %v3590_v13 }
 0x47d   : > { %3287 = vmatpush3.bf16.msra.mxu0 %v3590_v13  ;;  %3401 = vmatpush3.bf16.msra.mxu1 %v3590_v13 }
 0x480   : > { %3289 = vmatmul.mubr.bf16.vlgmr.msra.gmra.mxu0 %v1830_v61  ;;  %3297 = vmatmul.mubr.bf16.vlgmr.msra.gmra.mxu1 %v1834_v6 }
 0x481   : > { %3292 = vmatprep.mubr.bf16.mxu0 %v1831_v7  ;;  %3300 = vmatprep.mubr.bf16.mxu1 %v1835_v62 }
 0x488   : > { %3293 = vmatmul.mubr.bf16.gmra.mxu0 %v1832_v14  ;;  %3301 = vmatmul.mubr.bf16.gmra.mxu1 %v1836_v15 }
 0x540   : > { %v3290_v63 = vpop.f32.mrf.mxu0  ;;  %v3298_v0 = vpop.f32.mrf.mxu1 }
 0x541   : > { %v1951_v17 = vadd.f32 %v3290_v63, %v2749_v1  ;;  %v1983_v19 = vadd.f32 %v3298_v0, %v2749_v1 }
 0x542   : > { %v1942_v8 = vpop.f32.mrf.mxu0  ;;  %v1974_v9 = vpop.f32.mrf.mxu1 }
 0x543   : > { %v1943_v22 = vadd.f32 %v2749_v1, %v1942_v8  ;;  %v1975_v23 = vadd.f32 %v2749_v1, %v1974_v9 }
 0x544   : > { %v3291_v18 = vpop.f32.mrf.mxu0  ;;  %v3299_v16 = vpop.f32.mrf.mxu1 }
 0x545   : > { %v1954_v20 = vadd.f32 %v3291_v18, %v2749_v1  ;;  %v1986_v21 = vadd.f32 %v3299_v16, %v2749_v1 }
 0x546   : > { %v1945_v24 = vpop.f32.mrf.mxu0  ;;  %v1977_v25 = vpop.f32.mrf.mxu1 }
 0x547   : > { %v2984_v26 = vpack.c.bf16 %v1954_v20, %v1951_v17  ;;  %v3004_v27 = vpack.c.bf16 %v1986_v21, %v1983_v19  ;;  %v1946_v28 = vadd.f32 %v2749_v1, %v1945_v24  ;;  %v1978_v29 = vadd.f32 %v2749_v1, %v1977_v25 }
 0x548   : > { %v3294_v30 = vpop.f32.mrf.mxu0  ;;  %v3302_v31 = vpop.f32.mrf.mxu1 }
 0x549   : > { %3038 = vst [vmem:[%s2072_s25 + $0x8] sm:$0xff] %v2984_v26   ;;  %3042 = vst [vmem:[%s2072_s25 + $0x28] sm:$0xff] %v3004_v27   ;;  %v2979_v32 = vpack.c.bf16 %v1946_v28, %v1943_v22  ;;  %v2999_v33 = vpack.c.bf16 %v1978_v29, %v1975_v23  ;;  %v1967_v38 = vadd.f32 %v3294_v30, %v2749_v1 }
 0x54a   : > { %v1958_v34 = vpop.f32.mrf.mxu0  ;;  %v1990_v35 = vpop.f32.mrf.mxu1  ;;  %v1999_v39 = vadd.f32 %v3302_v31, %v2749_v1 }
 0x54b   : > { %2980 = vst [vmem:[%s2072_s25] sm:$0xff] %v2979_v32   ;;  %3041 = vst [vmem:[%s2072_s25 + $0x20] sm:$0xff] %v2999_v33   ;;  %v1959_v42 = vadd.f32 %v2749_v1, %v1958_v34  ;;  %v1991_v43 = vadd.f32 %v2749_v1, %v1990_v35 }
 0x54c   : > { %v3295_v36 = vpop.f32.mrf.mxu0  ;;  %v3303_v37 = vpop.f32.mrf.mxu1 }
 0x54d   : > { %v1970_v40 = vadd.f32 %v3295_v36, %v2749_v1  ;;  %v2002_v41 = vadd.f32 %v3303_v37, %v2749_v1 }
 0x54e   : > { %v1961_v44 = vpop.f32.mrf.mxu0  ;;  %v1993_v45 = vpop.f32.mrf.mxu1 }
 0x54f   : > { %v2994_v46 = vpack.c.bf16 %v1970_v40, %v1967_v38  ;;  %v3014_v47 = vpack.c.bf16 %v2002_v41, %v1999_v39  ;;  %v1962_v48 = vadd.f32 %v2749_v1, %v1961_v44  ;;  %v1994_v49 = vadd.f32 %v2749_v1, %v1993_v45 }
 0x551   : > { %3040 = vst [vmem:[%s2072_s25 + $0x18] sm:$0xff] %v2994_v46   ;;  %3044 = vst [vmem:[%s2072_s25 + $0x38] sm:$0xff] %v3014_v47   ;;  %v2989_v5 = vpack.c.bf16 %v1962_v48, %v1959_v42  ;;  %v3009_v12 = vpack.c.bf16 %v1994_v49, %v1991_v43 }
 0x553   : > { %3039 = vst [vmem:[%s2072_s25 + $0x10] sm:$0xff] %v2989_v5   ;;  %3043 = vst [vmem:[%s2072_s25 + $0x30] sm:$0xff] %v3009_v12  }
 0x554 PF: > { %2091 = sbr.rel (%p2709_p5) target bundleno = 1944 (0x798), region = 92  ;;  %s4671_s20 = sld [smem:[#allocation22_spill]] (!%p2709_p5) }
 0x559   : > { %v3591_v13 = vld [vmem:[%s4639_s6 + $0x38] sm:$0xff]   ;;  %v3592_v61 = vld [vmem:[%s4639_s6 + $0x30] sm:$0xff]   ;;  %v2092_v6 = vpack.c.bf16 %v4250_v51, %v4248_v50  ;;  %v2096_v7 = vpack.c.bf16 %v4266_v55, %v4264_v54  ;;  %v3593_v62 = vld [vmem:[%s4639_s6 + $0x28] sm:$0xff]   ;;  %v2093_v15 = vpack.c.bf16 %v4254_v53, %v4252_v52  ;;  %v2097_v63 = vpack.c.bf16 %v4270_v57, %v4268_v56 }
 0x55a   : > { %3304 = vmatprep.subr.bf16.mxu0 %v3591_v13  ;;  %3402 = vmatprep.subr.bf16.mxu1 %v3591_v13  ;;  %v3594_v50 = vld [vmem:[%s4639_s6 + $0x20] sm:$0xff]   ;;  %v3595_v51 = vld [vmem:[%s4639_s6 + $0x18] sm:$0xff]   ;;  %v3596_v54 = vld [vmem:[%s4639_s6 + $0x10] sm:$0xff]   ;;  %v2094_v0 = vpack.c.bf16 %v4258_v3, %v4256_v2  ;;  %v2098_v1 = vpack.c.bf16 %v4274_v59, %v4272_v58  ;;  %v2095_v8 = vpack.c.bf16 %v4262_v11, %v4260_v10  ;;  %v2268_v53 = vlaneseq }
 0x55b   : > { %3305 = vmatpush3.bf16.msra.mxu0 %v3591_v13  ;;  %3410 = vmatpush3.bf16.msra.mxu1 %v3591_v13  ;;  %v3597_v55 = vld [vmem:[%s4639_s6 + $0x8] sm:$0xff]   ;;  %v3598_v14 = vld [vmem:[%s4639_s6] sm:$0xff]   ;;  %v2099_v52 = vpack.c.bf16 %v4278_v4, %v4276_v60 }
 0x55c   : > { %3306 = vmatprep.subr.bf16.mxu0 %v3592_v61  ;;  %3403 = vmatprep.subr.bf16.mxu1 %v3592_v61  ;;  %v4392_v56 = vand.u32 127, %v2268_v53  ;;  %v2776_v2 = vld [vmem:[%s4671_s20] ss:$0 sm:$0xff] }
 0x55d   : > { %3320 = vmatprep.mubr.bf16.mxu0 %v2092_v6  ;;  %3328 = vmatprep.mubr.bf16.mxu1 %v2096_v7 }
 0x55e   : > { %vm2270_vm1 = vcmp.lt.s32.totalorder %v4392_v56, 8 }
 0x55f   : > { %3307 = vmatpush3.bf16.msra.mxu0 %v3592_v61  ;;  %3411 = vmatpush3.bf16.msra.mxu1 %v3592_v61 }
 0x560   : > { %3308 = vmatprep.subr.bf16.mxu0 %v3593_v62  ;;  %3404 = vmatprep.subr.bf16.mxu1 %v3593_v62 }
 0x563   : > { %3309 = vmatpush3.bf16.msra.mxu0 %v3593_v62  ;;  %3412 = vmatpush3.bf16.msra.mxu1 %v3593_v62 }
 0x564   : > { %3310 = vmatprep.subr.bf16.mxu0 %v3594_v50  ;;  %3405 = vmatprep.subr.bf16.mxu1 %v3594_v50 }
 0x567   : > { %3311 = vmatpush3.bf16.msra.mxu0 %v3594_v50  ;;  %3413 = vmatpush3.bf16.msra.mxu1 %v3594_v50 }
 0x568   : > { %3312 = vmatprep.subr.bf16.mxu0 %v3595_v51  ;;  %3406 = vmatprep.subr.bf16.mxu1 %v3595_v51 }
 0x56b   : > { %3313 = vmatpush3.bf16.msra.mxu0 %v3595_v51  ;;  %3414 = vmatpush3.bf16.msra.mxu1 %v3595_v51 }
 0x56c   : > { %3314 = vmatprep.subr.bf16.mxu0 %v3596_v54  ;;  %3407 = vmatprep.subr.bf16.mxu1 %v3596_v54 }
 0x56f   : > { %3315 = vmatpush3.bf16.msra.mxu0 %v3596_v54  ;;  %3415 = vmatpush3.bf16.msra.mxu1 %v3596_v54 }
 0x570   : > { %3316 = vmatprep.subr.bf16.mxu0 %v3597_v55  ;;  %3408 = vmatprep.subr.bf16.mxu1 %v3597_v55 }
 0x573   : > { %3317 = vmatpush3.bf16.msra.mxu0 %v3597_v55  ;;  %3416 = vmatpush3.bf16.msra.mxu1 %v3597_v55 }
 0x574   : > { %3318 = vmatprep.subr.bf16.mxu0 %v3598_v14  ;;  %3409 = vmatprep.subr.bf16.mxu1 %v3598_v14 }
 0x577   : > { %3319 = vmatpush3.bf16.msra.mxu0 %v3598_v14  ;;  %3417 = vmatpush3.bf16.msra.mxu1 %v3598_v14 }
 0x57a   : > { %3321 = vmatmul.mubr.bf16.vlgmr.msra.gmra.mxu0 %v2093_v15  ;;  %3329 = vmatmul.mubr.bf16.vlgmr.msra.gmra.mxu1 %v2097_v63 }
 0x57b   : > { %3324 = vmatprep.mubr.bf16.mxu0 %v2094_v0  ;;  %3332 = vmatprep.mubr.bf16.mxu1 %v2098_v1 }
 0x582   : > { %3325 = vmatmul.mubr.bf16.gmra.mxu0 %v2095_v8  ;;  %3333 = vmatmul.mubr.bf16.gmra.mxu1 %v2099_v52 }
 0x63a   : > { %v3322_v3 = vpop.f32.mrf.mxu0  ;;  %v3330_v57 = vpop.f32.mrf.mxu1 }
 0x63b   : > { %v2214_v58 = vadd.f32 %v3322_v3, %v2776_v2  ;;  %v2246_v59 = vadd.f32 %v3330_v57, %v2776_v2 }
 0x63c   : > { %v2205_v9 = vpop.f32.mrf.mxu0  ;;  %v2237_v10 = vpop.f32.mrf.mxu1 }
 0x63d   : > { %v2206_v11 = vadd.f32 %v2776_v2, %v2205_v9  ;;  %v2281_v60 = vsel %vm2270_vm1, %v2246_v59, -inf  ;;  %v2273_v4 = vsel %vm2270_vm1, %v2214_v58, -inf  ;;  %v2238_v21 = vadd.f32 %v2776_v2, %v2237_v10 }
 0x63e   : > { %2307 = vmax.xlane.f32.xlu0 %v2281_v60  ;;  %v3331_v18 = vpop.f32.mrf.mxu1  ;;  %2291 = vmax.xlane.f32.xlu1 %v2273_v4  ;;  %v3323_v16 = vpop.f32.mrf.mxu0 }
 0x63f   : > { %v2217_v17 = vadd.f32 %v3323_v16, %v2776_v2  ;;  %v2249_v22 = vadd.f32 %v3331_v18, %v2776_v2  ;;  %v2271_v24 = vsel %vm2270_vm1, %v2206_v11, -inf  ;;  %v2279_v31 = vsel %vm2270_vm1, %v2238_v21, -inf }
 0x640   : > { %v2208_v19 = vpop.f32.mrf.mxu0  ;;  %v2240_v20 = vpop.f32.mrf.mxu1 }
 0x641   : > { %v2274_v23 = vsel %vm2270_vm1, %v2217_v17, -inf  ;;  %v2209_v28 = vadd.f32 %v2776_v2, %v2208_v19  ;;  %v2241_v29 = vadd.f32 %v2776_v2, %v2240_v20  ;;  %v2282_v30 = vsel %vm2270_vm1, %v2249_v22, -inf }
 0x642   : > { %2293 = vmax.xlane.f32.xlu1 %v2274_v23  ;;  %2287 = vmax.xlane.f32.xlu0 %v2271_v24  ;;  %v3326_v25 = vpop.f32.mrf.mxu0  ;;  %v3334_v26 = vpop.f32.mrf.mxu1 }
 0x643   : > { %v2230_v34 = vadd.f32 %v3326_v25, %v2776_v2  ;;  %v2280_v36 = vsel %vm2270_vm1, %v2241_v29, -inf  ;;  %v2272_v37 = vsel %vm2270_vm1, %v2209_v28, -inf  ;;  %v2262_v49 = vadd.f32 %v3334_v26, %v2776_v2 }
 0x644   : > { %v2221_v27 = vpop.f32.mrf.mxu0  ;;  %v2253_v33 = vpop.f32.mrf.mxu1 }
 0x645   : > { %v2277_v41 = vsel %vm2270_vm1, %v2230_v34, -inf  ;;  %v2222_v42 = vadd.f32 %v2776_v2, %v2221_v27  ;;  %v2254_v45 = vadd.f32 %v2776_v2, %v2253_v33  ;;  %v4432_v6 = vsel %vm2270_vm1, %v2262_v49, -inf }
 0x646   : > { %2309 = vmax.xlane.f32.xlu1 %v2282_v30  ;;  %2303 = vmax.xlane.f32.xlu0 %v2279_v31  ;;  %v3327_v32 = vpop.f32.mrf.mxu0  ;;  %v3335_v39 = vpop.f32.mrf.mxu1 }
 0x647   : > { %v2233_v35 = vadd.f32 %v3327_v32, %v2776_v2  ;;  %v2275_v48 = vsel %vm2270_vm1, %v2222_v42, -inf  ;;  %v2265_v5 = vadd.f32 %v3335_v39, %v2776_v2  ;;  %v2283_v13 = vsel %vm2270_vm1, %v2254_v45, -inf }
 0x648   : > { %v2224_v38 = vpop.f32.mrf.mxu0  ;;  %v2256_v44 = vpop.f32.mrf.mxu1 }
 0x649   : > { %v2278_v40 = vsel %vm2270_vm1, %v2233_v35, -inf  ;;  %v2225_v43 = vadd.f32 %v2776_v2, %v2224_v38  ;;  %v2257_v46 = vadd.f32 %v2776_v2, %v2256_v44  ;;  %v4428_v61 = vsel %vm2270_vm1, %v2265_v5, -inf }
 0x64a   : > { %2305 = vmax.xlane.f32.xlu1 %v2280_v36  ;;  %2289 = vmax.xlane.f32.xlu0 %v2272_v37 }
 0x64b   : > { %v2276_v47 = vsel %vm2270_vm1, %v2225_v43, -inf  ;;  %v2284_v12 = vsel %vm2270_vm1, %v2257_v46, -inf }
 0x64e   : > { %2301 = vmax.xlane.f32.xlu1 %v2278_v40  ;;  %2299 = vmax.xlane.f32.xlu0 %v2277_v41 }
 0x652   : > { %2297 = vmax.xlane.f32.xlu1 %v2276_v47  ;;  %2295 = vmax.xlane.f32.xlu0 %v2275_v48 }
 0x656   : > { %2313 = vmax.xlane.f32.xlu1 %v2284_v12  ;;  %2311 = vmax.xlane.f32.xlu0 %v2283_v13 }
 0x65a   : > { %2317 = vmax.xlane.f32.xlu1 %v4428_v61  ;;  %2315 = vmax.xlane.f32.xlu0 %v4432_v6 }
 0x6c7   : > { %v2308_v7 = vpop.xlane.xlu0 %2307  ;;  %v2292_v62 = vpop.xlane.xlu1 %2291 }
 0x6c8   : > { %v4436_v50 = vsub.f32 %v2273_v4, %v2292_v62  ;;  %v4438_v51 = vsub.f32 %v2281_v60, %v2308_v7 }
 0x6ca   : > { %v2339_v54 = vmul.f32 1.442695, %v4436_v50  ;;  %v2355_v63 = vmul.f32 1.442695, %v4438_v51 }
 0x6cb   : > { %v2294_v55 = vpop.xlane.xlu1 %2293  ;;  %v2288_v14 = vpop.xlane.xlu0 %2287 }
 0x6cc   : > { %v4441_v15 = vsub.f32 %v2274_v23, %v2294_v55  ;;  %3599 = vpow2.f32 %v2339_v54  ;;  %v4444_v0 = vsub.f32 %v2271_v24, %v2288_v14 }
 0x6ce   : > { %v2341_v1 = vmul.f32 1.442695, %v4441_v15  ;;  %v2335_v3 = vmul.f32 1.442695, %v4444_v0 }
 0x6cf   : > { %v2310_v8 = vpop.xlane.xlu1 %2309  ;;  %v2304_v52 = vpop.xlane.xlu0 %2303 }
 0x6d0   : > { %3601 = vpow2.f32 %v2341_v1  ;;  %v4447_v53 = vsub.f32 %v2282_v30, %v2310_v8  ;;  %v4449_v2 = vsub.f32 %v2279_v31, %v2304_v52 }
 0x6d1   : > { %3603 = vpow2.f32 %v2355_v63 }
 0x6d2   : > { %v2357_v57 = vmul.f32 1.442695, %v4447_v53  ;;  %v2351_v9 = vmul.f32 1.442695, %v4449_v2 }
 0x6d3   : > { %v2306_v58 = vpop.xlane.xlu1 %2305  ;;  %v2290_v59 = vpop.xlane.xlu0 %2289 }
 0x6d4   : > { %3605 = vpow2.f32 %v2357_v57  ;;  %v4454_v10 = vsub.f32 %v2280_v36, %v2306_v58  ;;  %v4456_v11 = vsub.f32 %v2272_v37, %v2290_v59 }
 0x6d5   : > { %3607 = vpow2.f32 %v2335_v3 }
 0x6d6   : > { %v2337_v60 = vmul.f32 1.442695, %v4456_v11  ;;  %3609 = vpow2.f32 %v2351_v9  ;;  %v2353_v16 = vmul.f32 1.442695, %v4454_v10 }
 0x6d7   : > { %v2302_v4 = vpop.xlane.xlu1 %2301  ;;  %v2300_v18 = vpop.xlane.xlu0 %2299 }
 0x6d8   : > { %v4460_v17 = vsub.f32 %v2278_v40, %v2302_v4  ;;  %v4462_v19 = vsub.f32 %v2277_v41, %v2300_v18  ;;  %3611 = vpow2.f32 %v2337_v60 }
 0x6d9   : > { %v3600_v20 = vpop.eup %3599  ;;  %3613 = vpow2.f32 %v2353_v16 }
 0x6da   : > { %v2347_v21 = vmul.f32 1.442695, %v4462_v19  ;;  %2371 = vadd.xlane.f32.xlu0 %v3600_v20  ;;  %v2349_v24 = vmul.f32 1.442695, %v4460_v17 }
 0x6db   : > { %v2298_v22 = vpop.xlane.xlu1 %2297  ;;  %v2296_v23 = vpop.xlane.xlu0 %2295 }
 0x6dc   : > { %v4466_v25 = vsub.f32 %v2276_v47, %v2298_v22  ;;  %v4468_v26 = vsub.f32 %v2275_v48, %v2296_v23  ;;  %3615 = vpow2.f32 %v2347_v21 }
 0x6dd   : > { %v3602_v27 = vpop.eup %3601  ;;  %3617 = vpow2.f32 %v2349_v24 }
 0x6de   : > { %v3604_v28 = vpop.eup %3603  ;;  %v2343_v29 = vmul.f32 1.442695, %v4468_v26  ;;  %2373 = vadd.xlane.f32.xlu1 %v3602_v27  ;;  %v2345_v32 = vmul.f32 1.442695, %v4466_v25 }
 0x6df   : > { %2387 = vadd.xlane.f32.xlu0 %v3604_v28  ;;  %v2314_v30 = vpop.xlane.xlu1 %2313  ;;  %v2312_v31 = vpop.xlane.xlu0 %2311 }
 0x6e0   : > { %v4472_v33 = vsub.f32 %v2284_v12, %v2314_v30  ;;  %v4474_v34 = vsub.f32 %v2283_v13, %v2312_v31  ;;  %3619 = vpow2.f32 %v2343_v29 }
 0x6e1   : > { %v3606_v35 = vpop.eup %3605  ;;  %3621 = vpow2.f32 %v2345_v32 }
 0x6e2   : > { %v3608_v36 = vpop.eup %3607  ;;  %v2359_v37 = vmul.f32 1.442695, %v4474_v34  ;;  %2389 = vadd.xlane.f32.xlu1 %v3606_v35  ;;  %v2361_v40 = vmul.f32 1.442695, %v4472_v33 }
 0x6e3   : > { %2367 = vadd.xlane.f32.xlu0 %v3608_v36  ;;  %v2318_v38 = vpop.xlane.xlu1 %2317  ;;  %v2316_v39 = vpop.xlane.xlu0 %2315 }
 0x6e4   : > { %v4479_v41 = vsub.f32 %v4432_v6, %v2316_v39  ;;  %v3610_v42 = vpop.eup %3609  ;;  %3623 = vpow2.f32 %v2359_v37  ;;  %v4482_v43 = vsub.f32 %v4428_v61, %v2318_v38 }
 0x6e5   : > { %v3612_v44 = vpop.eup %3611  ;;  %3625 = vpow2.f32 %v2361_v40 }
 0x6e6   : > { %v2363_v45 = vmul.f32 1.442695, %v4479_v41  ;;  %2369 = vadd.xlane.f32.xlu1 %v3612_v44  ;;  %v3614_v46 = vpop.eup %3613  ;;  %v2365_v47 = vmul.f32 1.442695, %v4482_v43 }
 0x6e7   : > { %2383 = vadd.xlane.f32.xlu0 %v3610_v42 }
 0x6e8   : > { %3627 = vpow2.f32 %v2363_v45 }
 0x6e9   : > { %v3616_v48 = vpop.eup %3615  ;;  %3629 = vpow2.f32 %v2365_v47 }
 0x6ea   : > { %2385 = vadd.xlane.f32.xlu1 %v3614_v46  ;;  %v3618_v49 = vpop.eup %3617 }
 0x6eb   : > { %2379 = vadd.xlane.f32.xlu0 %v3616_v48 }
 0x6ed   : > { %v3620_v5 = vpop.eup %3619 }
 0x6ee   : > { %2381 = vadd.xlane.f32.xlu1 %v3618_v49  ;;  %v3622_v12 = vpop.eup %3621 }
 0x6ef   : > { %2375 = vadd.xlane.f32.xlu0 %v3620_v5 }
 0x6f1   : > { %v3624_v13 = vpop.eup %3623 }
 0x6f2   : > { %2377 = vadd.xlane.f32.xlu1 %v3622_v12  ;;  %v3626_v61 = vpop.eup %3625 }
 0x6f3   : > { %2391 = vadd.xlane.f32.xlu0 %v3624_v13 }
 0x6f5   : > { %v3628_v6 = vpop.eup %3627 }
 0x6f6   : > { %2393 = vadd.xlane.f32.xlu1 %v3626_v61  ;;  %v3630_v7 = vpop.eup %3629 }
 0x6f7   : > { %2395 = vadd.xlane.f32.xlu0 %v3628_v6 }
 0x6fa   : > { %2397 = vadd.xlane.f32.xlu1 %v3630_v7 }
 0x763   : > { %v2372_v62 = vpop.xlane.xlu0 %2371 }
 0x764   : > { %3631 = vlog2.f32 %v2372_v62 }
 0x767   : > { %v2374_v54 = vpop.xlane.xlu1 %2373 }
 0x768   : > { %3633 = vlog2.f32 %v2374_v54  ;;  %v2388_v55 = vpop.xlane.xlu0 %2387 }
 0x769   : > { %3635 = vlog2.f32 %v2388_v55 }
 0x76b   : > { %v2390_v14 = vpop.xlane.xlu1 %2389 }
 0x76c   : > { %3637 = vlog2.f32 %v2390_v14  ;;  %v2368_v63 = vpop.xlane.xlu0 %2367 }
 0x76d   : > { %3639 = vlog2.f32 %v2368_v63 }
 0x76f   : > { %v2370_v1 = vpop.xlane.xlu1 %2369 }
 0x770   : > { %v2384_v8 = vpop.xlane.xlu0 %2383  ;;  %3641 = vlog2.f32 %v2370_v1 }
 0x771   : > { %v3632_v52 = vpop.eup %3631  ;;  %3643 = vlog2.f32 %v2384_v8 }
 0x772   : > { %v2404_v3 = vmul.f32 0.6931472, %v3632_v52 }
 0x773   : > { %v2386_v57 = vpop.xlane.xlu1 %2385 }
 0x774   : > { %v2380_v58 = vpop.xlane.xlu0 %2379  ;;  %v2433_v9 = vsub.f32 %v4436_v50, %v2404_v3  ;;  %3645 = vlog2.f32 %v2386_v57 }
 0x775   : > { %v3634_v59 = vpop.eup %3633  ;;  %3647 = vlog2.f32 %v2380_v58 }
 0x776   : > { %v3636_v60 = vpop.eup %3635  ;;  %v2406_v4 = vmul.f32 0.6931472, %v3634_v59  ;;  %v2449_v18 = vsel %vm2270_vm1, %v2433_v9, 0.0 }
 0x777   : > { %v2420_v16 = vmul.f32 0.6931472, %v3636_v60  ;;  %2465 = vst [vmem:[%s4035_s24 + $0x10] sm:$0xff] %v2449_v18  ;;  %v2382_v21 = vpop.xlane.xlu1 %2381 }
 0x778   : > { %v2434_v20 = vsub.f32 %v4441_v15, %v2406_v4  ;;  %v2376_v22 = vpop.xlane.xlu0 %2375  ;;  %3649 = vlog2.f32 %v2382_v21 }
 0x779   : > { %v3638_v23 = vpop.eup %3637  ;;  %v2441_v24 = vsub.f32 %v4438_v51, %v2420_v16  ;;  %3651 = vlog2.f32 %v2376_v22 }
 0x77a   : > { %v3640_v50 = vpop.eup %3639  ;;  %v2450_v27 = vsel %vm2270_vm1, %v2434_v20, 0.0  ;;  %v2422_v28 = vmul.f32 0.6931472, %v3638_v23 }
 0x77b   : > { %2466 = vst [vmem:[%s4035_s24 + $0x18] sm:$0xff] %v2450_v27  ;;  %v2457_v29 = vsel %vm2270_vm1, %v2441_v24, 0.0  ;;  %v2400_v30 = vmul.f32 0.6931472, %v3640_v50  ;;  %v2378_v31 = vpop.xlane.xlu1 %2377 }
 0x77c   : > { %2473 = vst [vmem:[%s4035_s24 + $0x50] sm:$0xff] %v2457_v29  ;;  %v2442_v15 = vsub.f32 %v4447_v53, %v2422_v28  ;;  %v2392_v32 = vpop.xlane.xlu0 %2391  ;;  %3653 = vlog2.f32 %v2378_v31 }
 0x77d   : > { %v2431_v51 = vsub.f32 %v4444_v0, %v2400_v30  ;;  %v3642_v35 = vpop.eup %3641  ;;  %3655 = vlog2.f32 %v2392_v32 }
 0x77e   : > { %v2458_v36 = vsel %vm2270_vm1, %v2442_v15, 0.0  ;;  %v3644_v37 = vpop.eup %3643  ;;  %v2402_v39 = vmul.f32 0.6931472, %v3642_v35 }
 0x77f   : > { %2474 = vst [vmem:[%s4035_s24 + $0x58] sm:$0xff] %v2458_v36  ;;  %v2447_v38 = vsel %vm2270_vm1, %v2431_v51, 0.0  ;;  %v2416_v53 = vmul.f32 0.6931472, %v3644_v37  ;;  %v2394_v40 = vpop.xlane.xlu1 %2393 }
 0x780   : > { %2463 = vst [vmem:[%s4035_s24] sm:$0xff] %v2447_v38  ;;  %v2396_v42 = vpop.xlane.xlu0 %2395  ;;  %v2432_v0 = vsub.f32 %v4456_v11, %v2402_v39  ;;  %3657 = vlog2.f32 %v2394_v40 }
 0x781   : > { %v3646_v44 = vpop.eup %3645  ;;  %v2439_v45 = vsub.f32 %v4449_v2, %v2416_v53  ;;  %3659 = vlog2.f32 %v2396_v42 }
 0x782   : > { %v3648_v46 = vpop.eup %3647  ;;  %v2448_v47 = vsel %vm2270_vm1, %v2432_v0, 0.0  ;;  %v2418_v48 = vmul.f32 0.6931472, %v3646_v44 }
 0x783   : > { %2464 = vst [vmem:[%s4035_s24 + $0x8] sm:$0xff] %v2448_v47  ;;  %v2455_v49 = vsel %vm2270_vm1, %v2439_v45, 0.0  ;;  %v2412_v5 = vmul.f32 0.6931472, %v3648_v46  ;;  %v2398_v12 = vpop.xlane.xlu1 %2397 }
 0x784   : > { %2471 = vst [vmem:[%s4035_s24 + $0x40] sm:$0xff] %v2455_v49  ;;  %v2440_v11 = vsub.f32 %v4454_v10, %v2418_v48  ;;  %3661 = vlog2.f32 %v2398_v12 }
 0x785   : > { %v3650_v2 = vpop.eup %3649  ;;  %v2437_v13 = vsub.f32 %v4462_v19, %v2412_v5 }
 0x786   : > { %v3652_v61 = vpop.eup %3651  ;;  %v2456_v6 = vsel %vm2270_vm1, %v2440_v11, 0.0  ;;  %v2414_v7 = vmul.f32 0.6931472, %v3650_v2 }
 0x787   : > { %2472 = vst [vmem:[%s4035_s24 + $0x48] sm:$0xff] %v2456_v6  ;;  %v2453_v62 = vsel %vm2270_vm1, %v2437_v13, 0.0  ;;  %v2408_v54 = vmul.f32 0.6931472, %v3652_v61 }
 0x788   : > { %2469 = vst [vmem:[%s4035_s24 + $0x30] sm:$0xff] %v2453_v62  ;;  %v2438_v55 = vsub.f32 %v4460_v17, %v2414_v7 }
 0x789   : > { %v3654_v10 = vpop.eup %3653  ;;  %v2435_v14 = vsub.f32 %v4468_v26, %v2408_v54 }
 0x78a   : > { %v3656_v63 = vpop.eup %3655  ;;  %v2454_v19 = vsel %vm2270_vm1, %v2438_v55, 0.0  ;;  %v2410_v1 = vmul.f32 0.6931472, %v3654_v10 }
 0x78b   : > { %2470 = vst [vmem:[%s4035_s24 + $0x38] sm:$0xff] %v2454_v19  ;;  %v2451_v8 = vsel %vm2270_vm1, %v2435_v14, 0.0  ;;  %v2424_v52 = vmul.f32 0.6931472, %v3656_v63 }
 0x78c   : > { %2467 = vst [vmem:[%s4035_s24 + $0x20] sm:$0xff] %v2451_v8  ;;  %v2436_v3 = vsub.f32 %v4466_v25, %v2410_v1 }
 0x78d   : > { %v3658_v17 = vpop.eup %3657  ;;  %v2443_v57 = vsub.f32 %v4474_v34, %v2424_v52 }
 0x78e   : > { %v3660_v26 = vpop.eup %3659  ;;  %v2452_v58 = vsel %vm2270_vm1, %v2436_v3, 0.0  ;;  %v2426_v59 = vmul.f32 0.6931472, %v3658_v17 }
 0x78f   : > { %2468 = vst [vmem:[%s4035_s24 + $0x28] sm:$0xff] %v2452_v58  ;;  %v2459_v9 = vsel %vm2270_vm1, %v2443_v57, 0.0  ;;  %v2428_v60 = vmul.f32 0.6931472, %v3660_v26 }
 0x790   : > { %2475 = vst [vmem:[%s4035_s24 + $0x60] sm:$0xff] %v2459_v9  ;;  %v2444_v4 = vsub.f32 %v4472_v33, %v2426_v59 }
 0x791   : > { %v3662_v18 = vpop.eup %3661  ;;  %v2445_v25 = vsub.f32 %v4479_v41, %v2428_v60 }
 0x792   : > { %v2460_v34 = vsel %vm2270_vm1, %v2444_v4, 0.0  ;;  %v2430_v16 = vmul.f32 0.6931472, %v3662_v18 }
 0x793   : > { %2476 = vst [vmem:[%s4035_s24 + $0x68] sm:$0xff] %v2460_v34  ;;  %v2461_v20 = vsel %vm2270_vm1, %v2445_v25, 0.0 }
 0x794   : > { %2477 = vst [vmem:[%s4035_s24 + $0x70] sm:$0xff] %v2461_v20  ;;  %v2446_v21 = vsub.f32 %v4482_v43, %v2430_v16 }
 0x796   : > { %v2462_v22 = vsel %vm2270_vm1, %v2446_v21, 0.0 }
 0x797   : > { %2478 = vst [vmem:[%s4035_s24 + $0x78] sm:$0xff] %v2462_v22 }
 0x798 PF: > { %s2855_s10 = sshll.u32 %s3807_s12, 11  ;;  %s4673_s21 = sld [smem:[#allocation23_spill]] }
 0x799   : > { %s2493_s18 = sshll.u32 %s4035_s24, 4  ;;  %s4561_s22 = scalar_lea.sflag [#allocation8], %s344_s7  ;;  %s4557_s18 = int_to_ptr.vmem [resolvable:$true] %s2493_s18 }
 0x79a   : > { %s3691_s30 = scalar_lea.vmem %s4557_s18, 2048  ;;  %s3834_s12 = smov [#allocation9]  }
 0x79b   : > { %p3692_p6 = scmp.ne.s32.totalorder %s4557_s18, %s3691_s30  ;;  %s3695_s27 = sshll.u32 %s3834_s12, 4  ;;  %s3696_s27 = int_to_ptr.vmem [resolvable:$false] %s3695_s27 }
 0x79c   : > { %s3697_s25 = scalar_lea.vmem %s3696_s27, 4096  ;;  %p3698_p9 = scmp.lt.s32.totalorder %s4557_s18, %s3696_s27 }
 0x79d   : > { %p3693_p4 = pnand %p3692_p6, %p3995_p1  ;;  %p3699_p10 = scmp.lt.s32.totalorder %s3697_s25, %s3691_s30 }
 0x79e   : > { %s4554_s19 = scalar_lea.hbm %s4673_s21, %s2855_s10 }
 0x79f   : > { %p3694_p8 = pneg %p3693_p4  ;;  %p3700_p11 = por %p3699_p10, %p3698_p9 }
 0x7a1   : > { %p3701_p12 = pnand %p3700_p11, %p3694_p8 }
 0x7a3   : > { %3704 = shalt.err (!%p3701_p12)
}
 0x7a4   : > { %s3705_s7 = scalar_lea.hbm %s4554_s19, 2048  ;;  %s3709_s11 = scalar_lea.hbm %s4673_s21, 4096 }
 0x7a5   : > { %p3706_p7 = scmp.ne.s32.totalorder %s4554_s19, %s3705_s7  ;;  %p3710_p5 = scmp.lt.s32.totalorder %s4554_s19, %s4673_s21 }
 0x7a6   : > { %p3711_p2 = scmp.lt.s32.totalorder %s3709_s11, %s3705_s7 }
 0x7a7   : > { %p3707_p13 = pnand %p3706_p7, %p3995_p1 }
 0x7a8   : > { %p3712_p6 = por %p3711_p2, %p3710_p5 }
 0x7a9   : > { %p3708_p0 = pneg %p3707_p13 }
 0x7ab   : > { %p3713_p4 = pnand %p3712_p6, %p3708_p0 }
 0x7ad   : > { %3716 = shalt.err (!%p3713_p4)
}
 0x7ae   : > { %s3835_s10 = smov 128   ;;  %s3836_s16 = smov 8  }
 0x7af   : > { %3420 = dma.vmem_to_hbm [thread:$0]  (%p3995_p1), %s4557_s18, 2048, %s4554_s19, %s4561_s22, %s3835_s10, %s3835_s10, %s3836_s16  }
 0x7b0 PF: > { %s4674_s8 = sld [smem:[#allocation12_spill]]  ;;  %p3431_p8 = scmp.ge.s32.totalorder %s3827_s17, 2 }
 0x7b2   : > { %p3427_p9 = pnand %p3431_p8, %p4000_p3 }
 0x7b4   : > { %p3428_p10 = pneg %p3427_p9 }
 0x7b6   : > { %s2508_s30 = sand.u32 1, %s4674_s8  }
 0x7b7   : > { %s2509_s12 = scalar_lea.sflag [#allocation8], %s2508_s30 }
 0x7b8   : > { %3774 = dma.done.wait (%p3428_p10), %s2509_s12, 2048  }
 0x7b9   : > { %3776 = vsyncadd (%p3428_p10), %s2509_s12, 4294965248  ;;  %s24_s17 = sadd.s32 1, %s3827_s17   ;;  %s4676_s13 = sld [smem:[#allocation13_spill]] }
 0x7ba   : > { %p4589_p11 = scmp.ge.s32.totalorder %s24_s17, 14   ;;  %s4677_s29 = sld [smem:[#allocation20_spill]] }
 0x7bb   : > { %s4678_s19 = sld [smem:[#allocation14_spill]]  ;;  %s4685_s27 = smov %s3783_s28 }
 0x7bc   : > { %s4679_s10 = sld [smem:[#allocation19_spill]]  ;;  %s4687_s30 = smov %s3795_s9 }
 0x7bd   : > { %s4680_s26 = sld [smem:[#allocation15_spill]]  ;;  %s4689_s11 = smov %s3815_s14 }
 0x7be   : > { %s4681_s18 = sld [smem:[#allocation16_spill]]  ;;  %s4690_s12 = smov %s3819_s15 }
 0x7bf   : > { %s4682_s22 = sld [smem:[#allocation17_spill]]  ;;  %s4686_s28 = smov %s4676_s13 }
 0x7c0   : > { %s4683_s16 = sld [smem:[#allocation18_spill]] }
 0x7c1   : > { %s4688_s9 = smov %s4678_s19  ;;  %23 = sbr.rel (!%p4589_p11) target bundleno = 13 (0xd), region = 138 }
 0x7c3   : > { %s4691_s13 = smov %s4680_s26 }
 0x7c4   : > { %s4692_s14 = smov %s4681_s18 }
 0x7c5   : > { %s4693_s15 = smov %s4682_s22 }
 0x7c6   :  { %2514 = vsyncpa [#allocation7], 1 }
 0x7c7   :  { %2516 = vsyncpa [#allocation7 + $0x1], 1 }
 0x7c8   :  { %2517 = vsyncpa [#allocation8], 1 }
 0x7c9   :  { %2519 = vsyncpa [#allocation8 + $0x1], 1 }

</bundles_post_ra>
